<compile_context>
chip_gen: v5e
topology: v5e:2x2
jax: 0.10.0
libtpu: 0.0.40
codegen_flags: <defaults>
</compile_context>

<pallas_src>
import jax
import jax.numpy as jnp
from jax import lax
from jax.experimental import pallas as pl
from jax.experimental.pallas import tpu as pltpu


def _round_up(n, m):
    return (n + m - 1) // m * m


_GATE_PERM = (0, 1, 3, 2)   # PyTorch gate order [i, f, g, o] -> packed [i, f, o, g]


def _pack_gate_matrix(w, H, Hp, K, Kp, dtype):
    """PyTorch gate-stacked (4H, K) matrix -> (Kp, 4*Hp), transposed for
    right-multiplication; gates reordered to [i, f, o, g], each gate occupying
    a lane-aligned Hp-wide column block."""
    w4 = w.reshape(4, H, K)[jnp.array(_GATE_PERM)]
    w4 = jnp.pad(w4, ((0, 0), (0, Hp - H), (0, Kp - K)))
    return jnp.transpose(w4, (2, 0, 1)).reshape(Kp, 4 * Hp).astype(dtype)


def _pack_gate_bias(b, H, Hp):
    b4 = b.reshape(4, H)[jnp.array(_GATE_PERM)]
    b4 = jnp.pad(b4, ((0, 0), (0, Hp - H)))
    return b4.reshape(1, 4 * Hp).astype(jnp.float32)


def _make_lstm_kernel(T, chunk_T, BT, Hp, unroll):
    """Kernel closure over static sizes.

    Grid = (num_batch_tiles, num_chunks); batch axis "parallel" (megacore),
    chunk axis "arbitrary".  Every grid step runs Phase 1 on one time-chunk of
    x; Phase 2 (recurrence) + Phase 3 (fc) run once per batch tile on the last
    chunk, when the gates scratch is fully written.
    """
    chunk_rows = chunk_T * BT

    def kernel(x_ref, wih_ref, whh_ref, b_ref, wfc_ref, bfc_ref,
               out_ref, gates_sc):
        c = pl.program_id(1)

        # ---- Phase 1: input projection for this time-chunk (one MXU matmul).
        # gates_x[t, b, :] = x_t[b] @ W_ih_packed + (b_ih + b_hh)
        gx = (jnp.dot(x_ref[0], wih_ref[...],
                      preferred_element_type=jnp.float32)
              + b_ref[...])                                   # (chunk_rows, 4Hp)
        row0 = pl.multiple_of(c * chunk_rows, chunk_rows)
        gates_sc[pl.ds(row0, chunk_rows), :] = gx

        # ---- Phase 2 + 3: sequential recurrence + fused fc (last chunk only).
        @pl.when(c == pl.num_programs(1) - 1)
        def _():
            # Loop-invariant recurrence weights, hoisted out of the time loop.
            # TODO(synk): verify in the bundle dump that Mosaic latches this
            # constant MXU RHS across steps; otherwise drive the MXU explicitly
            # with pltpu.matmul_push_rhs / matmul_acc_lhs / matmul_pop.
            w_hh = whh_ref[...]
            h0 = jnp.zeros((BT, Hp), jnp.float32)
            c0 = jnp.zeros((BT, Hp), jnp.float32)

            def step(t, carry):
                h, c_state = carry
                r0 = pl.multiple_of(t * BT, BT)
                gxt = gates_sc[pl.ds(r0, BT), :]              # (BT, 4Hp), f32
                gates = gxt + jnp.dot(h.astype(w_hh.dtype), w_hh,
                                      preferred_element_type=jnp.float32)
                # Packed gate order [i, f, o, g]: one sigmoid over a single
                # contiguous lane-aligned (BT, 3*Hp) slab, one tanh for g.
                sig = jax.nn.sigmoid(gates[:, :3 * Hp])
                i = sig[:, 0 * Hp:1 * Hp]
                f = sig[:, 1 * Hp:2 * Hp]
                o = sig[:, 2 * Hp:3 * Hp]
                g = jnp.tanh(gates[:, 3 * Hp:4 * Hp])
                # Padded hidden lanes stay exactly 0 only because (h0, c0) = 0:
                # there i = f = o = 0.5 and g = 0, so c_new = 0.5*0 + 0.5*0 = 0
                # and h_new = 0.5*tanh(0) = 0.  Non-zero initial state would
                # require explicitly masking the padded lanes.
                c_new = f * c_state + i * g
                h_new = o * jnp.tanh(c_new)
                return h_new, c_new

            h_T, _ = lax.fori_loop(0, T, step, (h0, c0), unroll=unroll)

            # ---- Phase 3: fc on the last hidden state (lane-dense store). ----
            out_ref[...] = (jnp.dot(h_T.astype(wfc_ref.dtype), wfc_ref[...],
                                    preferred_element_type=jnp.float32)
                            + bfc_ref[...])

    return kernel


def lstm_model_forward(x_btd, w_ih, w_hh, b_ih, b_hh, w_fc, b_fc,
                       compute_dtype=jnp.float32,
                       chunk_T=None, max_batch_tile=128):
    """x_btd: (B, T, D) float32 (PyTorch batch_first).
    w_ih: (4H, D), w_hh: (4H, H), b_ih/b_hh: (4H,), w_fc: (O, H), b_fc: (O,).
    compute_dtype: dtype of MXU operands (bf16 recommended on v5e/v6e/v7x — the
    MXU is natively bf16 everywhere); accumulation and element-wise state stay
    f32.  chunk_T: timesteps per Phase-1 grid step (pipelines the x DMA).
    max_batch_tile: batch rows per recurrence step (MXU height; extra tiles go
    on a "parallel" grid axis and can use both v7x TensorCores).
    Returns (B, O) f32."""
    B, T, D = x_btd.shape
    H = w_hh.shape[1]
    O = w_fc.shape[0]

    # Batch tiling: fill the MXU height per recurrence step.
    BT = _round_up(min(_round_up(B, 8), max_batch_tile), 8)
    Bp = _round_up(B, BT)
    NBT = Bp // BT

    Dp = _round_up(D, 128)     # lane-aligned contraction dim
    Hp = _round_up(H, 128)     # lane-aligned hidden dim
    Op = _round_up(O, 128)     # lane-dense output stores

    if chunk_T is None:
        chunk_T = min(T, 64)
    chunk_T = max(1, min(chunk_T, T))
    T_pad = _round_up(T, chunk_T)
    num_chunks = T_pad // chunk_T
    chunk_rows = chunk_T * BT

    # Time-major, padded x laid out as (NBT, T_pad*BT, Dp) so each grid step
    # streams exactly one (chunk_T*BT, Dp) lane/sublane-dense slab.  Padded
    # timesteps are never read by the recurrence (it runs t in [0, T)).
    x = jnp.transpose(x_btd, (1, 0, 2))                        # (T, B, D)
    x = jnp.pad(x, ((0, T_pad - T), (0, Bp - B), (0, Dp - D)))
    x = (x.reshape(T_pad, NBT, BT, Dp)
          .transpose(1, 0, 2, 3)
          .reshape(NBT, T_pad * BT, Dp)
          .astype(compute_dtype))

    wih_p = _pack_gate_matrix(w_ih, H, Hp, D, Dp, compute_dtype)   # (Dp, 4Hp)
    whh_p = _pack_gate_matrix(w_hh, H, Hp, H, Hp, compute_dtype)   # (Hp, 4Hp)
    b_p = _pack_gate_bias(b_ih + b_hh, H, Hp)                      # (1, 4Hp) f32
    wfc_p = jnp.pad(jnp.transpose(w_fc),
                    ((0, Hp - H), (0, Op - O))).astype(compute_dtype)  # (Hp, Op)
    bfc_p = jnp.pad(b_fc.reshape(1, O),
                    ((0, 0), (0, Op - O))).astype(jnp.float32)         # (1, Op)

    # VMEM budget from the actual resident set (pipelined inputs are
    # double-buffered by Pallas even with constant index_maps).
    bpe = int(jnp.dtype(compute_dtype).itemsize)
    need = (2 * chunk_rows * Dp * bpe                 # x chunk, double-buffered
            + 2 * (Dp + Hp) * 4 * Hp * bpe            # W_ih, W_hh packed
            + 2 * Hp * Op * bpe                       # W_fc^T
            + 2 * (4 * Hp + Op) * 4                   # biases (f32)
            + T_pad * BT * 4 * Hp * 4                 # gates scratch (f32)
            + 2 * BT * Op * 4)                        # output block
    # Headroom, floor at the 32 MiB default, cap well under 128 MiB (v5e/v6e);
    # at these sizes the resident set stays far below v7x's 64 MiB too.
    vmem_limit = int(min(max(2 * need + (8 << 20), 32 << 20), 96 << 20))

    # Cap the recurrence unroll (full unroll over large T causes vreg spills).
    unroll = max(1, min(T, 8))
    kernel = _make_lstm_kernel(T, chunk_T, BT, Hp, unroll)

    grid_spec = pltpu.PrefetchScalarGridSpec(
        num_scalar_prefetch=0,
        grid=(NBT, num_chunks),   # (batch tiles "parallel", time chunks "arbitrary")
        in_specs=[
            pl.BlockSpec((1, chunk_rows, Dp), lambda b, c: (b, c, 0)),   # x chunk
            pl.BlockSpec((Dp, 4 * Hp), lambda b, c: (0, 0)),             # W_ih
            pl.BlockSpec((Hp, 4 * Hp), lambda b, c: (0, 0)),             # W_hh
            pl.BlockSpec((1, 4 * Hp), lambda b, c: (0, 0)),              # bias
            pl.BlockSpec((Hp, Op), lambda b, c: (0, 0)),                 # W_fc^T
            pl.BlockSpec((1, Op), lambda b, c: (0, 0)),                  # b_fc
        ],
        out_specs=pl.BlockSpec((BT, Op), lambda b, c: (b, 0)),
        scratch_shapes=[
            pltpu.VMEM((T_pad * BT, 4 * Hp), jnp.float32),   # gates_x scratch
        ],
    )

    out_pad = pl.pallas_call(
        kernel,
        out_shape=jax.ShapeDtypeStruct((Bp, Op), jnp.float32),
        grid_spec=grid_spec,
        compiler_params=pltpu.CompilerParams(
            dimension_semantics=("parallel", "arbitrary"),
            vmem_limit_bytes=vmem_limit),
    )(x, wih_p, whh_p, b_p, wfc_p, bfc_p)

    return out_pad[:B, :O]


def lstm_model_ref(x_btd, w_ih, w_hh, b_ih, b_hh, w_fc, b_fc):
    """Pure-JAX reference matching torch.nn.LSTM (batch_first) + Linear."""
    B, T, D = x_btd.shape
    H = w_hh.shape[1]
    h0 = jnp.zeros((B, H), jnp.float32)
    c0 = jnp.zeros((B, H), jnp.float32)

    def step(carry, x_t):
        h, c = carry
        gates = x_t @ w_ih.T + b_ih + h @ w_hh.T + b_hh
        i = jax.nn.sigmoid(gates[:, 0 * H:1 * H])
        f = jax.nn.sigmoid(gates[:, 1 * H:2 * H])
        g = jnp.tanh(gates[:, 2 * H:3 * H])
        o = jax.nn.sigmoid(gates[:, 3 * H:4 * H])
        c_new = f * c + i * g
        h_new = o * jnp.tanh(c_new)
        return (h_new, c_new), None

    (hT, _), _ = lax.scan(step, (h0, c0), jnp.transpose(x_btd, (1, 0, 2)))
    return hT @ w_fc.T + b_fc


if __name__ == "__main__":
    # Shapes consistent with the module: input_dim=28, hidden_dim=100,
    # output_dim=10; batch=2, seq=8.
    B, T, D, H, O = 2, 8, 28, 100, 10

    key = jax.random.PRNGKey(0)
    ks = jax.random.split(key, 8)
    scale = 0.1
    x = jax.random.normal(ks[0], (B, T, D), jnp.float32)
    w_ih = scale * jax.random.normal(ks[1], (4 * H, D), jnp.float32)
    w_hh = scale * jax.random.normal(ks[2], (4 * H, H), jnp.float32)
    b_ih = scale * jax.random.normal(ks[3], (4 * H,), jnp.float32)
    b_hh = scale * jax.random.normal(ks[4], (4 * H,), jnp.float32)
    w_fc = scale * jax.random.normal(ks[5], (O, H), jnp.float32)
    b_fc = scale * jax.random.normal(ks[6], (O,), jnp.float32)

    ref = jax.block_until_ready(
        lstm_model_ref(x, w_ih, w_hh, b_ih, b_hh, w_fc, b_fc))

    # 1) f32 MXU operands (exact vs reference up to accumulation order).
    out_f32 = jax.block_until_ready(
        lstm_model_forward(x, w_ih, w_hh, b_ih, b_hh, w_fc, b_fc))
    assert out_f32.shape == (B, O)
    assert jnp.allclose(out_f32, ref, atol=1e-4, rtol=1e-4), (out_f32, ref)

    # 2) bf16 MXU operands, f32 accumulation / state (fast path on all gens).
    out_bf16 = jax.block_until_ready(
        lstm_model_forward(x, w_ih, w_hh, b_ih, b_hh, w_fc, b_fc,
                           compute_dtype=jnp.bfloat16))
    assert out_bf16.shape == (B, O)
    assert jnp.allclose(out_bf16, ref, atol=5e-2, rtol=5e-2), (out_bf16, ref)

    # 3) Exercise multi-batch-tile ("parallel" axis) + multi-chunk pipelining.
    B2 = 10
    x2 = jax.random.normal(ks[7], (B2, T, D), jnp.float32)
    ref2 = jax.block_until_ready(
        lstm_model_ref(x2, w_ih, w_hh, b_ih, b_hh, w_fc, b_fc))
    out2 = jax.block_until_ready(
        lstm_model_forward(x2, w_ih, w_hh, b_ih, b_hh, w_fc, b_fc,
                           chunk_T=4, max_batch_tile=8))
    assert out2.shape == (B2, O)
    assert jnp.allclose(out2, ref2, atol=1e-4, rtol=1e-4), (out2, ref2)

    print("KERNEL_OK")
</pallas_src>

<mosaic_0001>
module attributes {stable_mosaic.version = 11 : i64} {
  func.func @kernel(%arg0: i32, %arg1: i32, %arg2: memref<1x64x128xf32, #tpu.memory_space<vmem>>, %arg3: memref<128x512xf32, #tpu.memory_space<vmem>>, %arg4: memref<128x512xf32, #tpu.memory_space<vmem>>, %arg5: memref<1x512xf32, #tpu.memory_space<vmem>>, %arg6: memref<128x128xf32, #tpu.memory_space<vmem>>, %arg7: memref<1x128xf32, #tpu.memory_space<vmem>>, %arg8: memref<8x128xf32, #tpu.memory_space<vmem>>, %arg9: memref<64x512xf32, #tpu.memory_space<vmem>>) attributes {dimension_semantics = [#tpu.dimension_semantics<parallel>, #tpu.dimension_semantics<arbitrary>], iteration_bounds = array<i64: 1, 1>, scalar_prefetch = 0 : i64, scratch_operands = 1 : i64, tpu.core_type = #tpu.core_type<tc>, window_params = [{transform_indices = @transform_0, window_bounds = array<i64: 1, 64, 128>}, {pipeline_mode = #tpu.pipeline_mode<synchronous>, transform_indices = @transform_1, window_bounds = array<i64: 128, 512>}, {pipeline_mode = #tpu.pipeline_mode<synchronous>, transform_indices = @transform_2, window_bounds = array<i64: 128, 512>}, {pipeline_mode = #tpu.pipeline_mode<synchronous>, transform_indices = @transform_3, window_bounds = array<i64: 1, 512>}, {pipeline_mode = #tpu.pipeline_mode<synchronous>, transform_indices = @transform_4, window_bounds = array<i64: 128, 128>}, {pipeline_mode = #tpu.pipeline_mode<synchronous>, transform_indices = @transform_5, window_bounds = array<i64: 1, 128>}, {transform_indices = @transform_6, window_bounds = array<i64: 8, 128>}]} {
    %c0 = arith.constant 0 : index
    %c0_0 = arith.constant 0 : index
    %c0_1 = arith.constant 0 : index
    %0 = vector.load %arg2[%c0, %c0_0, %c0_1] : memref<1x64x128xf32, #tpu.memory_space<vmem>>, vector<1x64x128xf32>
    %1 = vector.shape_cast %0 : vector<1x64x128xf32> to vector<64x128xf32>
    %c0_2 = arith.constant 0 : index
    %c0_3 = arith.constant 0 : index
    %2 = vector.load %arg3[%c0_2, %c0_3] : memref<128x512xf32, #tpu.memory_space<vmem>>, vector<128x512xf32>
    %cst = arith.constant dense<0.000000e+00> : vector<64x512xf32>
    %3 = tpu.matmul %1, %2, %cst {dimension_numbers = #tpu.dot_dimension_numbers<[1], [0], [0], [1], [0, 0, 1, 1], [], []>} : vector<64x128xf32>, vector<128x512xf32>, vector<64x512xf32> -> vector<64x512xf32>
    %c0_4 = arith.constant 0 : index
    %c0_5 = arith.constant 0 : index
    %4 = vector.load %arg5[%c0_4, %c0_5] : memref<1x512xf32, #tpu.memory_space<vmem>>, vector<1x512xf32>
    %5 = vector.broadcast %4 : vector<1x512xf32> to vector<64x512xf32>
    %6 = arith.addf %3, %5 : vector<64x512xf32>
    %c64_i32 = arith.constant 64 : i32
    %7 = arith.muli %arg1, %c64_i32 : i32
    %8 = tpu.assume_multiple %7, 64 : i32
    %9 = arith.index_cast %8 : i32 to index
    %c0_6 = arith.constant 0 : index
    %10 = vector.load %arg9[%9, %c0_6] : memref<64x512xf32, #tpu.memory_space<vmem>>, vector<64x512xf32>
    tpu.vector_store %arg9[%9, %c0_6], %6 {strides = array<i32>} : memref<64x512xf32, #tpu.memory_space<vmem>>, vector<64x512xf32>,
    %c0_i32 = arith.constant 0 : i32
    %11 = arith.cmpi eq, %arg1, %c0_i32 : i32
    %12 = arith.extui %11 : i1 to i32
    %c0_i32_7 = arith.constant 0 : i32
    %13 = arith.cmpi ne, %12, %c0_i32_7 : i32
    scf.if %13 {
      %c0_8 = arith.constant 0 : index
      %c0_9 = arith.constant 0 : index
      %14 = vector.load %arg4[%c0_8, %c0_9] : memref<128x512xf32, #tpu.memory_space<vmem>>, vector<128x512xf32>
      %cst_10 = arith.constant 0.000000e+00 : f32
      %15 = vector.broadcast %cst_10 : f32 to vector<8x128xf32>
      %cst_11 = arith.constant 0.000000e+00 : f32
      %16 = vector.broadcast %cst_11 : f32 to vector<8x128xf32>
      %c0_i32_12 = arith.constant 0 : i32
      %c8_i32 = arith.constant 8 : i32
      %17 = arith.muli %c0_i32_12, %c8_i32 : i32
      %18 = tpu.assume_multiple %17, 8 : i32
      %19 = arith.index_cast %18 : i32 to index
      %c0_13 = arith.constant 0 : index
      %20 = vector.load %arg9[%19, %c0_13] : memref<64x512xf32, #tpu.memory_space<vmem>>, vector<8x512xf32>
      %cst_14 = arith.constant dense<0.000000e+00> : vector<8x512xf32>
      %21 = tpu.matmul %15, %14, %cst_14 {dimension_numbers = #tpu.dot_dimension_numbers<[1], [0], [0], [1], [0, 0, 1, 1], [], []>} : vector<8x128xf32>, vector<128x512xf32>, vector<8x512xf32> -> vector<8x512xf32>
      %22 = arith.addf %20, %21 : vector<8x512xf32>
      %23 = vector.extract_strided_slice %22 {offsets = [0, 0], sizes = [8, 384], strides = [1, 1]} : vector<8x512xf32> to vector<8x384xf32>
      %24 = arith.negf %23 : vector<8x384xf32>
      %25 = math.exp %24 : vector<8x384xf32>
      %cst_15 = arith.constant 1.000000e+00 : f32
      %26 = vector.broadcast %cst_15 : f32 to vector<8x384xf32>
      %27 = arith.addf %26, %25 : vector<8x384xf32>
      %28 = arith.divf %26, %27 : vector<8x384xf32>
      %29 = vector.extract_strided_slice %28 {offsets = [0, 0], sizes = [8, 128], strides = [1, 1]} : vector<8x384xf32> to vector<8x128xf32>
      %30 = vector.extract_strided_slice %28 {offsets = [0, 128], sizes = [8, 128], strides = [1, 1]} : vector<8x384xf32> to vector<8x128xf32>
      %31 = vector.extract_strided_slice %28 {offsets = [0, 256], sizes = [8, 128], strides = [1, 1]} : vector<8x384xf32> to vector<8x128xf32>
      %32 = vector.extract_strided_slice %22 {offsets = [0, 384], sizes = [8, 128], strides = [1, 1]} : vector<8x512xf32> to vector<8x128xf32>
      %33 = math.tanh %32 : vector<8x128xf32>
      %34 = arith.mulf %30, %16 : vector<8x128xf32>
      %35 = arith.mulf %29, %33 : vector<8x128xf32>
      %36 = arith.addf %34, %35 : vector<8x128xf32>
      %37 = math.tanh %36 : vector<8x128xf32>
      %38 = arith.mulf %31, %37 : vector<8x128xf32>
      %c1_i32 = arith.constant 1 : i32
      %c8_i32_16 = arith.constant 8 : i32
      %39 = arith.muli %c1_i32, %c8_i32_16 : i32
      %40 = tpu.assume_multiple %39, 8 : i32
      %41 = arith.index_cast %40 : i32 to index
      %c0_17 = arith.constant 0 : index
      %42 = vector.load %arg9[%41, %c0_17] : memref<64x512xf32, #tpu.memory_space<vmem>>, vector<8x512xf32>
      %cst_18 = arith.constant dense<0.000000e+00> : vector<8x512xf32>
      %43 = tpu.matmul %38, %14, %cst_18 {dimension_numbers = #tpu.dot_dimension_numbers<[1], [0], [0], [1], [0, 0, 1, 1], [], []>} : vector<8x128xf32>, vector<128x512xf32>, vector<8x512xf32> -> vector<8x512xf32>
      %44 = arith.addf %42, %43 : vector<8x512xf32>
      %45 = vector.extract_strided_slice %44 {offsets = [0, 0], sizes = [8, 384], strides = [1, 1]} : vector<8x512xf32> to vector<8x384xf32>
      %46 = arith.negf %45 : vector<8x384xf32>
      %47 = math.exp %46 : vector<8x384xf32>
      %cst_19 = arith.constant 1.000000e+00 : f32
      %48 = vector.broadcast %cst_19 : f32 to vector<8x384xf32>
      %49 = arith.addf %48, %47 : vector<8x384xf32>
      %50 = arith.divf %48, %49 : vector<8x384xf32>
      %51 = vector.extract_strided_slice %50 {offsets = [0, 0], sizes = [8, 128], strides = [1, 1]} : vector<8x384xf32> to vector<8x128xf32>
      %52 = vector.extract_strided_slice %50 {offsets = [0, 128], sizes = [8, 128], strides = [1, 1]} : vector<8x384xf32> to vector<8x128xf32>
      %53 = vector.extract_strided_slice %50 {offsets = [0, 256], sizes = [8, 128], strides = [1, 1]} : vector<8x384xf32> to vector<8x128xf32>
      %54 = vector.extract_strided_slice %44 {offsets = [0, 384], sizes = [8, 128], strides = [1, 1]} : vector<8x512xf32> to vector<8x128xf32>
      %55 = math.tanh %54 : vector<8x128xf32>
      %56 = arith.mulf %52, %36 : vector<8x128xf32>
      %57 = arith.mulf %51, %55 : vector<8x128xf32>
      %58 = arith.addf %56, %57 : vector<8x128xf32>
      %59 = math.tanh %58 : vector<8x128xf32>
      %60 = arith.mulf %53, %59 : vector<8x128xf32>
      %c2_i32 = arith.constant 2 : i32
      %c8_i32_20 = arith.constant 8 : i32
      %61 = arith.muli %c2_i32, %c8_i32_20 : i32
      %62 = tpu.assume_multiple %61, 8 : i32
      %63 = arith.index_cast %62 : i32 to index
      %c0_21 = arith.constant 0 : index
      %64 = vector.load %arg9[%63, %c0_21] : memref<64x512xf32, #tpu.memory_space<vmem>>, vector<8x512xf32>
      %cst_22 = arith.constant dense<0.000000e+00> : vector<8x512xf32>
      %65 = tpu.matmul %60, %14, %cst_22 {dimension_numbers = #tpu.dot_dimension_numbers<[1], [0], [0], [1], [0, 0, 1, 1], [], []>} : vector<8x128xf32>, vector<128x512xf32>, vector<8x512xf32> -> vector<8x512xf32>
      %66 = arith.addf %64, %65 : vector<8x512xf32>
      %67 = vector.extract_strided_slice %66 {offsets = [0, 0], sizes = [8, 384], strides = [1, 1]} : vector<8x512xf32> to vector<8x384xf32>
      %68 = arith.negf %67 : vector<8x384xf32>
      %69 = math.exp %68 : vector<8x384xf32>
      %cst_23 = arith.constant 1.000000e+00 : f32
      %70 = vector.broadcast %cst_23 : f32 to vector<8x384xf32>
      %71 = arith.addf %70, %69 : vector<8x384xf32>
      %72 = arith.divf %70, %71 : vector<8x384xf32>
      %73 = vector.extract_strided_slice %72 {offsets = [0, 0], sizes = [8, 128], strides = [1, 1]} : vector<8x384xf32> to vector<8x128xf32>
      %74 = vector.extract_strided_slice %72 {offsets = [0, 128], sizes = [8, 128], strides = [1, 1]} : vector<8x384xf32> to vector<8x128xf32>
      %75 = vector.extract_strided_slice %72 {offsets = [0, 256], sizes = [8, 128], strides = [1, 1]} : vector<8x384xf32> to vector<8x128xf32>
      %76 = vector.extract_strided_slice %66 {offsets = [0, 384], sizes = [8, 128], strides = [1, 1]} : vector<8x512xf32> to vector<8x128xf32>
      %77 = math.tanh %76 : vector<8x128xf32>
      %78 = arith.mulf %74, %58 : vector<8x128xf32>
      %79 = arith.mulf %73, %77 : vector<8x128xf32>
      %80 = arith.addf %78, %79 : vector<8x128xf32>
      %81 = math.tanh %80 : vector<8x128xf32>
      %82 = arith.mulf %75, %81 : vector<8x128xf32>
      %c3_i32 = arith.constant 3 : i32
      %c8_i32_24 = arith.constant 8 : i32
      %83 = arith.muli %c3_i32, %c8_i32_24 : i32
      %84 = tpu.assume_multiple %83, 8 : i32
      %85 = arith.index_cast %84 : i32 to index
      %c0_25 = arith.constant 0 : index
      %86 = vector.load %arg9[%85, %c0_25] : memref<64x512xf32, #tpu.memory_space<vmem>>, vector<8x512xf32>
      %cst_26 = arith.constant dense<0.000000e+00> : vector<8x512xf32>
      %87 = tpu.matmul %82, %14, %cst_26 {dimension_numbers = #tpu.dot_dimension_numbers<[1], [0], [0], [1], [0, 0, 1, 1], [], []>} : vector<8x128xf32>, vector<128x512xf32>, vector<8x512xf32> -> vector<8x512xf32>
      %88 = arith.addf %86, %87 : vector<8x512xf32>
      %89 = vector.extract_strided_slice %88 {offsets = [0, 0], sizes = [8, 384], strides = [1, 1]} : vector<8x512xf32> to vector<8x384xf32>
      %90 = arith.negf %89 : vector<8x384xf32>
      %91 = math.exp %90 : vector<8x384xf32>
      %cst_27 = arith.constant 1.000000e+00 : f32
      %92 = vector.broadcast %cst_27 : f32 to vector<8x384xf32>
      %93 = arith.addf %92, %91 : vector<8x384xf32>
      %94 = arith.divf %92, %93 : vector<8x384xf32>
      %95 = vector.extract_strided_slice %94 {offsets = [0, 0], sizes = [8, 128], strides = [1, 1]} : vector<8x384xf32> to vector<8x128xf32>
      %96 = vector.extract_strided_slice %94 {offsets = [0, 128], sizes = [8, 128], strides = [1, 1]} : vector<8x384xf32> to vector<8x128xf32>
      %97 = vector.extract_strided_slice %94 {offsets = [0, 256], sizes = [8, 128], strides = [1, 1]} : vector<8x384xf32> to vector<8x128xf32>
      %98 = vector.extract_strided_slice %88 {offsets = [0, 384], sizes = [8, 128], strides = [1, 1]} : vector<8x512xf32> to vector<8x128xf32>
      %99 = math.tanh %98 : vector<8x128xf32>
      %100 = arith.mulf %96, %80 : vector<8x128xf32>
      %101 = arith.mulf %95, %99 : vector<8x128xf32>
      %102 = arith.addf %100, %101 : vector<8x128xf32>
      %103 = math.tanh %102 : vector<8x128xf32>
      %104 = arith.mulf %97, %103 : vector<8x128xf32>
      %c4_i32 = arith.constant 4 : i32
      %c8_i32_28 = arith.constant 8 : i32
      %105 = arith.muli %c4_i32, %c8_i32_28 : i32
      %106 = tpu.assume_multiple %105, 8 : i32
      %107 = arith.index_cast %106 : i32 to index
      %c0_29 = arith.constant 0 : index
      %108 = vector.load %arg9[%107, %c0_29] : memref<64x512xf32, #tpu.memory_space<vmem>>, vector<8x512xf32>
      %cst_30 = arith.constant dense<0.000000e+00> : vector<8x512xf32>
      %109 = tpu.matmul %104, %14, %cst_30 {dimension_numbers = #tpu.dot_dimension_numbers<[1], [0], [0], [1], [0, 0, 1, 1], [], []>} : vector<8x128xf32>, vector<128x512xf32>, vector<8x512xf32> -> vector<8x512xf32>
      %110 = arith.addf %108, %109 : vector<8x512xf32>
      %111 = vector.extract_strided_slice %110 {offsets = [0, 0], sizes = [8, 384], strides = [1, 1]} : vector<8x512xf32> to vector<8x384xf32>
      %112 = arith.negf %111 : vector<8x384xf32>
      %113 = math.exp %112 : vector<8x384xf32>
      %cst_31 = arith.constant 1.000000e+00 : f32
      %114 = vector.broadcast %cst_31 : f32 to vector<8x384xf32>
      %115 = arith.addf %114, %113 : vector<8x384xf32>
      %116 = arith.divf %114, %115 : vector<8x384xf32>
      %117 = vector.extract_strided_slice %116 {offsets = [0, 0], sizes = [8, 128], strides = [1, 1]} : vector<8x384xf32> to vector<8x128xf32>
      %118 = vector.extract_strided_slice %116 {offsets = [0, 128], sizes = [8, 128], strides = [1, 1]} : vector<8x384xf32> to vector<8x128xf32>
      %119 = vector.extract_strided_slice %116 {offsets = [0, 256], sizes = [8, 128], strides = [1, 1]} : vector<8x384xf32> to vector<8x128xf32>
      %120 = vector.extract_strided_slice %110 {offsets = [0, 384], sizes = [8, 128], strides = [1, 1]} : vector<8x512xf32> to vector<8x128xf32>
      %121 = math.tanh %120 : vector<8x128xf32>
      %122 = arith.mulf %118, %102 : vector<8x128xf32>
      %123 = arith.mulf %117, %121 : vector<8x128xf32>
      %124 = arith.addf %122, %123 : vector<8x128xf32>
      %125 = math.tanh %124 : vector<8x128xf32>
      %126 = arith.mulf %119, %125 : vector<8x128xf32>
      %c5_i32 = arith.constant 5 : i32
      %c8_i32_32 = arith.constant 8 : i32
      %127 = arith.muli %c5_i32, %c8_i32_32 : i32
      %128 = tpu.assume_multiple %127, 8 : i32
      %129 = arith.index_cast %128 : i32 to index
      %c0_33 = arith.constant 0 : index
      %130 = vector.load %arg9[%129, %c0_33] : memref<64x512xf32, #tpu.memory_space<vmem>>, vector<8x512xf32>
      %cst_34 = arith.constant dense<0.000000e+00> : vector<8x512xf32>
      %131 = tpu.matmul %126, %14, %cst_34 {dimension_numbers = #tpu.dot_dimension_numbers<[1], [0], [0], [1], [0, 0, 1, 1], [], []>} : vector<8x128xf32>, vector<128x512xf32>, vector<8x512xf32> -> vector<8x512xf32>
      %132 = arith.addf %130, %131 : vector<8x512xf32>
      %133 = vector.extract_strided_slice %132 {offsets = [0, 0], sizes = [8, 384], strides = [1, 1]} : vector<8x512xf32> to vector<8x384xf32>
      %134 = arith.negf %133 : vector<8x384xf32>
      %135 = math.exp %134 : vector<8x384xf32>
      %cst_35 = arith.constant 1.000000e+00 : f32
      %136 = vector.broadcast %cst_35 : f32 to vector<8x384xf32>
      %137 = arith.addf %136, %135 : vector<8x384xf32>
      %138 = arith.divf %136, %137 : vector<8x384xf32>
      %139 = vector.extract_strided_slice %138 {offsets = [0, 0], sizes = [8, 128], strides = [1, 1]} : vector<8x384xf32> to vector<8x128xf32>
      %140 = vector.extract_strided_slice %138 {offsets = [0, 128], sizes = [8, 128], strides = [1, 1]} : vector<8x384xf32> to vector<8x128xf32>
      %141 = vector.extract_strided_slice %138 {offsets = [0, 256], sizes = [8, 128], strides = [1, 1]} : vector<8x384xf32> to vector<8x128xf32>
      %142 = vector.extract_strided_slice %132 {offsets = [0, 384], sizes = [8, 128], strides = [1, 1]} : vector<8x512xf32> to vector<8x128xf32>
      %143 = math.tanh %142 : vector<8x128xf32>
      %144 = arith.mulf %140, %124 : vector<8x128xf32>
      %145 = arith.mulf %139, %143 : vector<8x128xf32>
      %146 = arith.addf %144, %145 : vector<8x128xf32>
      %147 = math.tanh %146 : vector<8x128xf32>
      %148 = arith.mulf %141, %147 : vector<8x128xf32>
      %c6_i32 = arith.constant 6 : i32
      %c8_i32_36 = arith.constant 8 : i32
      %149 = arith.muli %c6_i32, %c8_i32_36 : i32
      %150 = tpu.assume_multiple %149, 8 : i32
      %151 = arith.index_cast %150 : i32 to index
      %c0_37 = arith.constant 0 : index
      %152 = vector.load %arg9[%151, %c0_37] : memref<64x512xf32, #tpu.memory_space<vmem>>, vector<8x512xf32>
      %cst_38 = arith.constant dense<0.000000e+00> : vector<8x512xf32>
      %153 = tpu.matmul %148, %14, %cst_38 {dimension_numbers = #tpu.dot_dimension_numbers<[1], [0], [0], [1], [0, 0, 1, 1], [], []>} : vector<8x128xf32>, vector<128x512xf32>, vector<8x512xf32> -> vector<8x512xf32>
      %154 = arith.addf %152, %153 : vector<8x512xf32>
      %155 = vector.extract_strided_slice %154 {offsets = [0, 0], sizes = [8, 384], strides = [1, 1]} : vector<8x512xf32> to vector<8x384xf32>
      %156 = arith.negf %155 : vector<8x384xf32>
      %157 = math.exp %156 : vector<8x384xf32>
      %cst_39 = arith.constant 1.000000e+00 : f32
      %158 = vector.broadcast %cst_39 : f32 to vector<8x384xf32>
      %159 = arith.addf %158, %157 : vector<8x384xf32>
      %160 = arith.divf %158, %159 : vector<8x384xf32>
      %161 = vector.extract_strided_slice %160 {offsets = [0, 0], sizes = [8, 128], strides = [1, 1]} : vector<8x384xf32> to vector<8x128xf32>
      %162 = vector.extract_strided_slice %160 {offsets = [0, 128], sizes = [8, 128], strides = [1, 1]} : vector<8x384xf32> to vector<8x128xf32>
      %163 = vector.extract_strided_slice %160 {offsets = [0, 256], sizes = [8, 128], strides = [1, 1]} : vector<8x384xf32> to vector<8x128xf32>
      %164 = vector.extract_strided_slice %154 {offsets = [0, 384], sizes = [8, 128], strides = [1, 1]} : vector<8x512xf32> to vector<8x128xf32>
      %165 = math.tanh %164 : vector<8x128xf32>
      %166 = arith.mulf %162, %146 : vector<8x128xf32>
      %167 = arith.mulf %161, %165 : vector<8x128xf32>
      %168 = arith.addf %166, %167 : vector<8x128xf32>
      %169 = math.tanh %168 : vector<8x128xf32>
      %170 = arith.mulf %163, %169 : vector<8x128xf32>
      %c7_i32 = arith.constant 7 : i32
      %c8_i32_40 = arith.constant 8 : i32
      %171 = arith.muli %c7_i32, %c8_i32_40 : i32
      %172 = tpu.assume_multiple %171, 8 : i32
      %173 = arith.index_cast %172 : i32 to index
      %c0_41 = arith.constant 0 : index
      %174 = vector.load %arg9[%173, %c0_41] : memref<64x512xf32, #tpu.memory_space<vmem>>, vector<8x512xf32>
      %cst_42 = arith.constant dense<0.000000e+00> : vector<8x512xf32>
      %175 = tpu.matmul %170, %14, %cst_42 {dimension_numbers = #tpu.dot_dimension_numbers<[1], [0], [0], [1], [0, 0, 1, 1], [], []>} : vector<8x128xf32>, vector<128x512xf32>, vector<8x512xf32> -> vector<8x512xf32>
      %176 = arith.addf %174, %175 : vector<8x512xf32>
      %177 = vector.extract_strided_slice %176 {offsets = [0, 0], sizes = [8, 384], strides = [1, 1]} : vector<8x512xf32> to vector<8x384xf32>
      %178 = arith.negf %177 : vector<8x384xf32>
      %179 = math.exp %178 : vector<8x384xf32>
      %cst_43 = arith.constant 1.000000e+00 : f32
      %180 = vector.broadcast %cst_43 : f32 to vector<8x384xf32>
      %181 = arith.addf %180, %179 : vector<8x384xf32>
      %182 = arith.divf %180, %181 : vector<8x384xf32>
      %183 = vector.extract_strided_slice %182 {offsets = [0, 0], sizes = [8, 128], strides = [1, 1]} : vector<8x384xf32> to vector<8x128xf32>
      %184 = vector.extract_strided_slice %182 {offsets = [0, 128], sizes = [8, 128], strides = [1, 1]} : vector<8x384xf32> to vector<8x128xf32>
      %185 = vector.extract_strided_slice %182 {offsets = [0, 256], sizes = [8, 128], strides = [1, 1]} : vector<8x384xf32> to vector<8x128xf32>
      %186 = vector.extract_strided_slice %176 {offsets = [0, 384], sizes = [8, 128], strides = [1, 1]} : vector<8x512xf32> to vector<8x128xf32>
      %187 = math.tanh %186 : vector<8x128xf32>
      %188 = arith.mulf %184, %168 : vector<8x128xf32>
      %189 = arith.mulf %183, %187 : vector<8x128xf32>
      %190 = arith.addf %188, %189 : vector<8x128xf32>
      %191 = math.tanh %190 : vector<8x128xf32>
      %192 = arith.mulf %185, %191 : vector<8x128xf32>
      %c8_i32_44 = arith.constant 8 : i32
      %c0_45 = arith.constant 0 : index
      %c0_46 = arith.constant 0 : index
      %193 = vector.load %arg6[%c0_45, %c0_46] : memref<128x128xf32, #tpu.memory_space<vmem>>, vector<128x128xf32>
      %cst_47 = arith.constant dense<0.000000e+00> : vector<8x128xf32>
      %194 = tpu.matmul %192, %193, %cst_47 {dimension_numbers = #tpu.dot_dimension_numbers<[1], [0], [0], [1], [0, 0, 1, 1], [], []>} : vector<8x128xf32>, vector<128x128xf32>, vector<8x128xf32> -> vector<8x128xf32>
      %c0_48 = arith.constant 0 : index
      %c0_49 = arith.constant 0 : index
      %195 = vector.load %arg7[%c0_48, %c0_49] : memref<1x128xf32, #tpu.memory_space<vmem>>, vector<1x128xf32>
      %196 = vector.broadcast %195 : vector<1x128xf32> to vector<8x128xf32>
      %197 = arith.addf %194, %196 : vector<8x128xf32>
      %c0_50 = arith.constant 0 : index
      %c0_51 = arith.constant 0 : index
      %198 = vector.load %arg8[%c0_50, %c0_51] : memref<8x128xf32, #tpu.memory_space<vmem>>, vector<8x128xf32>
      tpu.vector_store %arg8[%c0_50, %c0_51], %197 {strides = array<i32>} : memref<8x128xf32, #tpu.memory_space<vmem>>, vector<8x128xf32>,
    } else {
    }
    return
  }
  func.func @transform_0(%arg0: i32, %arg1: i32) -> (i32, i32, i32) {
    %c0_i32 = arith.constant 0 : i32
    %c0_i32_0 = arith.constant 0 : i32
    return %arg0, %arg1, %c0_i32 : i32, i32, i32
  }
  func.func @transform_1(%arg0: i32, %arg1: i32) -> (i32, i32) {
    %c0_i32 = arith.constant 0 : i32
    %c0_i32_0 = arith.constant 0 : i32
    %c0_i32_1 = arith.constant 0 : i32
    return %c0_i32, %c0_i32_0 : i32, i32
  }
  func.func @transform_2(%arg0: i32, %arg1: i32) -> (i32, i32) {
    %c0_i32 = arith.constant 0 : i32
    %c0_i32_0 = arith.constant 0 : i32
    %c0_i32_1 = arith.constant 0 : i32
    return %c0_i32, %c0_i32_0 : i32, i32
  }
  func.func @transform_3(%arg0: i32, %arg1: i32) -> (i32, i32) {
    %c0_i32 = arith.constant 0 : i32
    %c0_i32_0 = arith.constant 0 : i32
    %c0_i32_1 = arith.constant 0 : i32
    return %c0_i32, %c0_i32_0 : i32, i32
  }
  func.func @transform_4(%arg0: i32, %arg1: i32) -> (i32, i32) {
    %c0_i32 = arith.constant 0 : i32
    %c0_i32_0 = arith.constant 0 : i32
    %c0_i32_1 = arith.constant 0 : i32
    return %c0_i32, %c0_i32_0 : i32, i32
  }
  func.func @transform_5(%arg0: i32, %arg1: i32) -> (i32, i32) {
    %c0_i32 = arith.constant 0 : i32
    %c0_i32_0 = arith.constant 0 : i32
    %c0_i32_1 = arith.constant 0 : i32
    return %c0_i32, %c0_i32_0 : i32, i32
  }
  func.func @transform_6(%arg0: i32, %arg1: i32) -> (i32, i32) {
    %c0_i32 = arith.constant 0 : i32
    %c0_i32_0 = arith.constant 0 : i32
    return %arg0, %c0_i32 : i32, i32
  }
}

</mosaic_0001>

<bundles_post_ra>
// kernel: tpu_custom_call.1
= control target key start
LH: loop header
LB: loop body
LE: loop exit
PB: predicated region body
PF: predicated region fallthrough
CT: control target
= control target key end

     0   :  { %11 = vsyncpa [#allocation4], 0  ;;  %s3106_s0 = inlined_call_operand.hbm [shape: f32[1,64,128], index: 0, kind: input, shape index: {}]   ;;  %s3107_s1 = inlined_call_operand.hbm [shape: f32[128,512], index: 1, kind: input, shape index: {}]   ;;  %s3108_s2 = inlined_call_operand.hbm [shape: f32[128,512], index: 2, kind: input, shape index: {}]   ;;  %s3109_s3 = inlined_call_operand.hbm [shape: f32[1,512], index: 3, kind: input, shape index: {}]   ;;  %s3110_s4 = inlined_call_operand.hbm [shape: f32[128,128], index: 4, kind: input, shape index: {}]   ;;  %s3111_s5 = inlined_call_operand.vmem [shape: f32[1,128], index: 5, kind: input, shape index: {}]   ;;  %s3112_s6 = inlined_call_operand.hbm [shape: f32[8,128], index: 6, kind: output, shape index: {}]  }
   0x1   :  { %12 = vsyncpa [#allocation7], 0 }
   0x2   :  { %13 = vsyncpa [#allocation10], 0  ;;  %s32_s23 = sshll.u32 %s3107_s1, 4  ;;  %s33_s23 = int_to_ptr.hbm [resolvable:$true] %s32_s23 }
   0x3   :  { %14 = vsyncpa [#allocation5], 0  ;;  %s2133_s24 = smov [#allocation6]   ;;  %s59_s28 = sshll.u32 %s3109_s3, 4  ;;  %s60_s28 = int_to_ptr.hbm [resolvable:$true] %s59_s28 }
   0x4   :  { %s34_s25 = sshll.u32 %s2133_s24, 4  ;;  %s2134_s29 = smov 512   ;;  %s35_s25 = int_to_ptr.vmem [resolvable:$true] %s34_s25 }
   0x5   :  { %s2135_s30 = smov 32   ;;  %s2136_s7 = smov [#allocation9]  }
   0x6   :  { %40 = dma.hbm_to_vmem [thread:$0]  %s33_s23, 8192, %s35_s25, [#allocation7], %s2134_s29, %s2134_s29, %s2135_s30  }
   0x7   :  { %s61_s8 = sshll.u32 %s2136_s7, 4  ;;  %s19_s11 = sshll.u32 %s3106_s0, 4  ;;  %s62_s8 = int_to_ptr.vmem [resolvable:$true] %s61_s8  ;;  %s20_s11 = int_to_ptr.hbm [resolvable:$true] %s19_s11 }
   0x8   :  { %64 = dma.hbm_to_vmem [thread:$0]  %s60_s28, 64, %s62_s8, [#allocation10]  }
   0x9   :  { %s2137_s1 = smov [#allocation3]   ;;  %s45_s3 = sshll.u32 %s3108_s2, 4  ;;  %s46_s3 = int_to_ptr.hbm [resolvable:$true] %s45_s3 }
   0xa   :  { %s21_s12 = sshll.u32 %s2137_s1, 4  ;;  %s2138_s15 = smov 128   ;;  %s22_s12 = int_to_ptr.vmem [resolvable:$true] %s21_s12 }
   0xb   :  { %s2139_s16 = smov 8   ;;  %s2140_s17 = smov [#allocation8]  }
   0xc   :  { %27 = dma.hbm_to_vmem [thread:$0]  %s20_s11, 1024, %s22_s12, [#allocation4], %s2138_s15, %s2138_s15, %s2139_s16  }
   0xd   :  { %s47_s18 = sshll.u32 %s2140_s17, 4  ;;  %s69_s0 = sshll.u32 %s3110_s4, 4  ;;  %s48_s18 = int_to_ptr.vmem [resolvable:$true] %s47_s18  ;;  %s70_s0 = int_to_ptr.hbm [resolvable:$true] %s69_s0 }
   0xe   :  { %53 = dma.hbm_to_vmem [thread:$0]  %s46_s3, 8192, %s48_s18, [#allocation7], %s2134_s29, %s2134_s29, %s2135_s30  }
   0xf   :  { %s2141_s21 = smov [#allocation11]  }
  0x10   :  { %s71_s22 = sshll.u32 %s2141_s21, 4  ;;  %s72_s22 = int_to_ptr.vmem [resolvable:$true] %s71_s22 }
  0x11   :  { %77 = dma.hbm_to_vmem [thread:$0]  %s70_s0, 2048, %s72_s22, [#allocation10], %s2138_s15, %s2138_s15, %s2139_s16  }
  0x12   :  { %2125 = dma.done.wait [#allocation4], 1024  }
  0x13   :  { %2126 = vsyncadd [#allocation4], 4294966272 }
  0x14   :  { %2127 = dma.done.wait [#allocation7], 16384  }
  0x15   :  { %2128 = vsyncadd [#allocation7], 4294950912 }
  0x16   :  { %2129 = dma.done.wait [#allocation10], 2112  }
  0x17   :  { %2130 = vsyncadd [#allocation10], 4294965184  ;;  %v168_v0 = vld [vmem:[#allocation6 + $0x1e0] sm:$0xff]  ;;  %v169_v1 = vld [vmem:[#allocation6 + $0x1e8] sm:$0xff]  ;;  %s2143_s23 = smov [#allocation12]   ;;  %s1732_s27 = sshll.u32 %s3112_s6, 4  ;;  %s1733_s27 = int_to_ptr.hbm [resolvable:$true] %s1732_s27 }
  0x18   :  { %v170_v2 = vld [vmem:[#allocation6 + $0x1f0] sm:$0xff]  ;;  %182 = vmatpush.msra.mxu0 %v168_v0  ;;  %223 = vmatpush.msra.mxu1 %v169_v1  ;;  %v171_v3 = vld [vmem:[#allocation6 + $0x1f8] sm:$0xff]  ;;  %v164_v4 = vld [vmem:[#allocation6 + $0x1c0] sm:$0xff]  ;;  %s1730_s24 = sshll.u32 %s2143_s23, 4  ;;  %s1731_s24 = int_to_ptr.vmem [resolvable:$true] %s1730_s24 }
  0x19   :  { %v165_v5 = vld [vmem:[#allocation6 + $0x1c8] sm:$0xff]  ;;  %264 = vmatpush.msra.mxu2 %v170_v2  ;;  %305 = vmatpush.msra.mxu3 %v171_v3  ;;  %v166_v6 = vld [vmem:[#allocation6 + $0x1d0] sm:$0xff]  ;;  %v167_v7 = vld [vmem:[#allocation6 + $0x1d8] sm:$0xff] }
  0x1a   :  { %v160_v8 = vld [vmem:[#allocation6 + $0x1a0] sm:$0xff]  ;;  %183 = vmatpush.msra.mxu0 %v164_v4  ;;  %224 = vmatpush.msra.mxu1 %v165_v5  ;;  %v161_v9 = vld [vmem:[#allocation6 + $0x1a8] sm:$0xff]  ;;  %v162_v10 = vld [vmem:[#allocation6 + $0x1b0] sm:$0xff] }
  0x1b   :  { %v163_v11 = vld [vmem:[#allocation6 + $0x1b8] sm:$0xff]  ;;  %265 = vmatpush.msra.mxu2 %v166_v6  ;;  %306 = vmatpush.msra.mxu3 %v167_v7  ;;  %v156_v12 = vld [vmem:[#allocation6 + $0x180] sm:$0xff]  ;;  %v157_v13 = vld [vmem:[#allocation6 + $0x188] sm:$0xff] }
  0x1c   :  { %184 = vmatpush.msra.mxu0 %v160_v8  ;;  %225 = vmatpush.msra.mxu1 %v161_v9  ;;  %v158_v14 = vld [vmem:[#allocation6 + $0x190] sm:$0xff]  ;;  %v159_v15 = vld [vmem:[#allocation6 + $0x198] sm:$0xff]  ;;  %v152_v16 = vld [vmem:[#allocation6 + $0x160] sm:$0xff] }
  0x1d   :  { %266 = vmatpush.msra.mxu2 %v162_v10  ;;  %307 = vmatpush.msra.mxu3 %v163_v11  ;;  %v153_v17 = vld [vmem:[#allocation6 + $0x168] sm:$0xff]  ;;  %v154_v18 = vld [vmem:[#allocation6 + $0x170] sm:$0xff]  ;;  %v155_v19 = vld [vmem:[#allocation6 + $0x178] sm:$0xff] }
  0x1e   :  { %185 = vmatpush.msra.mxu0 %v156_v12  ;;  %226 = vmatpush.msra.mxu1 %v157_v13  ;;  %v148_v20 = vld [vmem:[#allocation6 + $0x140] sm:$0xff]  ;;  %v149_v21 = vld [vmem:[#allocation6 + $0x148] sm:$0xff]  ;;  %v150_v22 = vld [vmem:[#allocation6 + $0x150] sm:$0xff] }
  0x1f   :  { %267 = vmatpush.msra.mxu2 %v158_v14  ;;  %308 = vmatpush.msra.mxu3 %v159_v15  ;;  %v151_v23 = vld [vmem:[#allocation6 + $0x158] sm:$0xff]  ;;  %v144_v24 = vld [vmem:[#allocation6 + $0x120] sm:$0xff]  ;;  %v145_v25 = vld [vmem:[#allocation6 + $0x128] sm:$0xff] }
  0x20   :  { %186 = vmatpush.msra.mxu0 %v152_v16  ;;  %227 = vmatpush.msra.mxu1 %v153_v17  ;;  %v146_v26 = vld [vmem:[#allocation6 + $0x130] sm:$0xff]  ;;  %v147_v27 = vld [vmem:[#allocation6 + $0x138] sm:$0xff]  ;;  %v140_v28 = vld [vmem:[#allocation6 + $0x100] sm:$0xff] }
  0x21   :  { %268 = vmatpush.msra.mxu2 %v154_v18  ;;  %309 = vmatpush.msra.mxu3 %v155_v19  ;;  %v141_v29 = vld [vmem:[#allocation6 + $0x108] sm:$0xff]  ;;  %v142_v30 = vld [vmem:[#allocation6 + $0x110] sm:$0xff]  ;;  %v143_v31 = vld [vmem:[#allocation6 + $0x118] sm:$0xff] }
  0x22   :  { %187 = vmatpush.msra.mxu0 %v148_v20  ;;  %228 = vmatpush.msra.mxu1 %v149_v21  ;;  %v136_v32 = vld [vmem:[#allocation6 + $0xe0] sm:$0xff]  ;;  %v137_v33 = vld [vmem:[#allocation6 + $0xe8] sm:$0xff]  ;;  %v138_v34 = vld [vmem:[#allocation6 + $0xf0] sm:$0xff] }
  0x23   :  { %269 = vmatpush.msra.mxu2 %v150_v22  ;;  %310 = vmatpush.msra.mxu3 %v151_v23  ;;  %v139_v35 = vld [vmem:[#allocation6 + $0xf8] sm:$0xff]  ;;  %v132_v36 = vld [vmem:[#allocation6 + $0xc0] sm:$0xff]  ;;  %v133_v37 = vld [vmem:[#allocation6 + $0xc8] sm:$0xff] }
  0x24   :  { %188 = vmatpush.msra.mxu0 %v144_v24  ;;  %229 = vmatpush.msra.mxu1 %v145_v25  ;;  %v134_v38 = vld [vmem:[#allocation6 + $0xd0] sm:$0xff]  ;;  %v135_v39 = vld [vmem:[#allocation6 + $0xd8] sm:$0xff]  ;;  %v128_v40 = vld [vmem:[#allocation6 + $0xa0] sm:$0xff] }
  0x25   :  { %270 = vmatpush.msra.mxu2 %v146_v26  ;;  %311 = vmatpush.msra.mxu3 %v147_v27  ;;  %v129_v41 = vld [vmem:[#allocation6 + $0xa8] sm:$0xff]  ;;  %v130_v42 = vld [vmem:[#allocation6 + $0xb0] sm:$0xff]  ;;  %v131_v43 = vld [vmem:[#allocation6 + $0xb8] sm:$0xff] }
  0x26   :  { %189 = vmatpush.msra.mxu0 %v140_v28  ;;  %230 = vmatpush.msra.mxu1 %v141_v29  ;;  %v124_v44 = vld [vmem:[#allocation6 + $0x80] sm:$0xff]  ;;  %v125_v45 = vld [vmem:[#allocation6 + $0x88] sm:$0xff]  ;;  %v126_v46 = vld [vmem:[#allocation6 + $0x90] sm:$0xff] }
  0x27   :  { %271 = vmatpush.msra.mxu2 %v142_v30  ;;  %312 = vmatpush.msra.mxu3 %v143_v31  ;;  %v127_v47 = vld [vmem:[#allocation6 + $0x98] sm:$0xff]  ;;  %v120_v48 = vld [vmem:[#allocation6 + $0x60] sm:$0xff]  ;;  %v121_v49 = vld [vmem:[#allocation6 + $0x68] sm:$0xff] }
  0x28   :  { %190 = vmatpush.msra.mxu0 %v136_v32  ;;  %231 = vmatpush.msra.mxu1 %v137_v33  ;;  %v122_v50 = vld [vmem:[#allocation6 + $0x70] sm:$0xff]  ;;  %v123_v51 = vld [vmem:[#allocation6 + $0x78] sm:$0xff]  ;;  %v116_v52 = vld [vmem:[#allocation6 + $0x40] sm:$0xff] }
  0x29   :  { %272 = vmatpush.msra.mxu2 %v138_v34  ;;  %313 = vmatpush.msra.mxu3 %v139_v35  ;;  %v117_v53 = vld [vmem:[#allocation6 + $0x48] sm:$0xff]  ;;  %v118_v54 = vld [vmem:[#allocation6 + $0x50] sm:$0xff]  ;;  %v119_v55 = vld [vmem:[#allocation6 + $0x58] sm:$0xff] }
  0x2a   :  { %191 = vmatpush.msra.mxu0 %v132_v36  ;;  %232 = vmatpush.msra.mxu1 %v133_v37  ;;  %v112_v56 = vld [vmem:[#allocation6 + $0x20] sm:$0xff]  ;;  %v113_v57 = vld [vmem:[#allocation6 + $0x28] sm:$0xff]  ;;  %v114_v58 = vld [vmem:[#allocation6 + $0x30] sm:$0xff] }
  0x2b   :  { %273 = vmatpush.msra.mxu2 %v134_v38  ;;  %314 = vmatpush.msra.mxu3 %v135_v39  ;;  %v115_v59 = vld [vmem:[#allocation6 + $0x38] sm:$0xff]  ;;  %v108_v60 = vld [vmem:[#allocation6] sm:$0xff]  ;;  %v109_v61 = vld [vmem:[#allocation6 + $0x8] sm:$0xff] }
  0x2c   :  { %192 = vmatpush.msra.mxu0 %v128_v40  ;;  %233 = vmatpush.msra.mxu1 %v129_v41  ;;  %v110_v62 = vld [vmem:[#allocation6 + $0x10] sm:$0xff]  ;;  %v111_v63 = vld [vmem:[#allocation6 + $0x18] sm:$0xff]  ;;  %v100_v0 = vld [vmem:[#allocation3] sm:$0xff] }
  0x2d   :  { %274 = vmatpush.msra.mxu2 %v130_v42  ;;  %315 = vmatpush.msra.mxu3 %v131_v43  ;;  %v2194_v1 = vld [vmem:[#allocation8 + $0x1e0] sm:$0xff]  ;;  %v2196_v2 = vld [vmem:[#allocation8 + $0x1e8] sm:$0xff]  ;;  %v2198_v3 = vld [vmem:[#allocation8 + $0x1f0] sm:$0xff] }
  0x2e   :  { %193 = vmatpush.msra.mxu0 %v124_v44  ;;  %234 = vmatpush.msra.mxu1 %v125_v45  ;;  %v2200_v4 = vld [vmem:[#allocation8 + $0x1f8] sm:$0xff]  ;;  %v2202_v5 = vld [vmem:[#allocation8 + $0x1c0] sm:$0xff]  ;;  %v2204_v6 = vld [vmem:[#allocation8 + $0x1c8] sm:$0xff] }
  0x2f   :  { %275 = vmatpush.msra.mxu2 %v126_v46  ;;  %316 = vmatpush.msra.mxu3 %v127_v47  ;;  %v2208_v7 = vld [vmem:[#allocation8 + $0x1d0] sm:$0xff]  ;;  %v2210_v8 = vld [vmem:[#allocation8 + $0x1d8] sm:$0xff]  ;;  %v2213_v9 = vld [vmem:[#allocation8 + $0x1a0] sm:$0xff] }
  0x30   :  { %194 = vmatpush.msra.mxu0 %v120_v48  ;;  %235 = vmatpush.msra.mxu1 %v121_v49  ;;  %v2215_v10 = vld [vmem:[#allocation8 + $0x1a8] sm:$0xff]  ;;  %v2220_v11 = vld [vmem:[#allocation8 + $0x1b0] sm:$0xff]  ;;  %v2222_v12 = vld [vmem:[#allocation8 + $0x1b8] sm:$0xff] }
  0x31   :  { %276 = vmatpush.msra.mxu2 %v122_v50  ;;  %317 = vmatpush.msra.mxu3 %v123_v51  ;;  %v101_v13 = vld [vmem:[#allocation3 + $0x8] sm:$0xff]  ;;  %v2228_v14 = vld [vmem:[#allocation8 + $0x180] sm:$0xff]  ;;  %v2234_v16 = vld [vmem:[#allocation8 + $0x190] sm:$0xff] }
  0x32   :  { %195 = vmatpush.msra.mxu0 %v116_v52  ;;  %236 = vmatpush.msra.mxu1 %v117_v53  ;;  %v2230_v15 = vld [vmem:[#allocation8 + $0x188] sm:$0xff]  ;;  %v2236_v17 = vld [vmem:[#allocation8 + $0x198] sm:$0xff]  ;;  %v2238_v18 = vld [vmem:[#allocation8 + $0x160] sm:$0xff] }
  0x33   :  { %277 = vmatpush.msra.mxu2 %v118_v54  ;;  %318 = vmatpush.msra.mxu3 %v119_v55  ;;  %v2240_v19 = vld [vmem:[#allocation8 + $0x168] sm:$0xff]  ;;  %v2244_v20 = vld [vmem:[#allocation8 + $0x170] sm:$0xff]  ;;  %v2246_v21 = vld [vmem:[#allocation8 + $0x178] sm:$0xff] }
  0x34   :  { %196 = vmatpush.msra.mxu0 %v112_v56  ;;  %237 = vmatpush.msra.mxu1 %v113_v57  ;;  %v2249_v22 = vld [vmem:[#allocation8 + $0x140] sm:$0xff]  ;;  %v2251_v23 = vld [vmem:[#allocation8 + $0x148] sm:$0xff]  ;;  %v2256_v24 = vld [vmem:[#allocation8 + $0x150] sm:$0xff] }
  0x35   :  { %278 = vmatpush.msra.mxu2 %v114_v58  ;;  %319 = vmatpush.msra.mxu3 %v115_v59  ;;  %v2258_v25 = vld [vmem:[#allocation8 + $0x158] sm:$0xff]  ;;  %v102_v26 = vld [vmem:[#allocation3 + $0x10] sm:$0xff]  ;;  %v2264_v27 = vld [vmem:[#allocation8 + $0x120] sm:$0xff] }
  0x36   :  { %197 = vmatpush.msra.mxu0 %v108_v60  ;;  %238 = vmatpush.msra.mxu1 %v109_v61  ;;  %v2266_v28 = vld [vmem:[#allocation8 + $0x128] sm:$0xff]  ;;  %v2270_v29 = vld [vmem:[#allocation8 + $0x130] sm:$0xff]  ;;  %v2272_v30 = vld [vmem:[#allocation8 + $0x138] sm:$0xff] }
  0x37   :  { %279 = vmatpush.msra.mxu2 %v110_v62  ;;  %320 = vmatpush.msra.mxu3 %v111_v63  ;;  %v2274_v31 = vld [vmem:[#allocation8 + $0x100] sm:$0xff]  ;;  %v2276_v32 = vld [vmem:[#allocation8 + $0x108] sm:$0xff]  ;;  %v2280_v33 = vld [vmem:[#allocation8 + $0x110] sm:$0xff] }
  0x38   :  { %198 = vmatmul.f32.vlgmr.msra.gmra.mxu0 %v100_v0  ;;  %239 = vmatmul.f32.vlgmr.msra.gmra.mxu1 %v100_v0  ;;  %v2282_v34 = vld [vmem:[#allocation8 + $0x118] sm:$0xff]  ;;  %v2285_v35 = vld [vmem:[#allocation8 + $0xe0] sm:$0xff]  ;;  %v2287_v36 = vld [vmem:[#allocation8 + $0xe8] sm:$0xff] }
  0x39   :  { %280 = vmatmul.f32.vlgmr.msra.gmra.mxu2 %v100_v0  ;;  %321 = vmatmul.f32.vlgmr.msra.gmra.mxu3 %v100_v0  ;;  %v2292_v37 = vld [vmem:[#allocation8 + $0xf0] sm:$0xff]  ;;  %v2294_v38 = vld [vmem:[#allocation8 + $0xf8] sm:$0xff]  ;;  %v2300_v40 = vld [vmem:[#allocation8 + $0xc0] sm:$0xff] }
  0x3a   :  { %459 = vmatpush.msrb.mxu0 %v2194_v1  ;;  %479 = vmatpush.msrb.mxu1 %v2196_v2  ;;  %v103_v39 = vld [vmem:[#allocation3 + $0x18] sm:$0xff]  ;;  %v2302_v41 = vld [vmem:[#allocation8 + $0xc8] sm:$0xff]  ;;  %v2306_v42 = vld [vmem:[#allocation8 + $0xd0] sm:$0xff] }
  0x3b   :  { %499 = vmatpush.msrb.mxu2 %v2198_v3  ;;  %519 = vmatpush.msrb.mxu3 %v2200_v4  ;;  %3200 = vst [vmem:[#allocation17_spill] sm:$0xff] %v2306_v42  ;;  %v2308_v43 = vld [vmem:[#allocation8 + $0xd8] sm:$0xff]  ;;  %v2310_v44 = vld [vmem:[#allocation8 + $0xa0] sm:$0xff]  ;;  %v2312_v45 = vld [vmem:[#allocation8 + $0xa8] sm:$0xff] }
  0x3c   :  { %460 = vmatpush.msrb.mxu0 %v2202_v5  ;;  %480 = vmatpush.msrb.mxu1 %v2204_v6  ;;  %3201 = vst [vmem:[#allocation18_spill] sm:$0xff] %v2308_v43  ;;  %v2316_v46 = vld [vmem:[#allocation8 + $0xb0] sm:$0xff]  ;;  %v2318_v47 = vld [vmem:[#allocation8 + $0xb8] sm:$0xff]  ;;  %v2321_v48 = vld [vmem:[#allocation8 + $0x80] sm:$0xff] }
  0x3d   :  { %500 = vmatpush.msrb.mxu2 %v2208_v7  ;;  %520 = vmatpush.msrb.mxu3 %v2210_v8  ;;  %3202 = vst [vmem:[#allocation19_spill] sm:$0xff] %v2310_v44  ;;  %v2323_v49 = vld [vmem:[#allocation8 + $0x88] sm:$0xff]  ;;  %v2328_v50 = vld [vmem:[#allocation8 + $0x90] sm:$0xff]  ;;  %v2330_v51 = vld [vmem:[#allocation8 + $0x98] sm:$0xff] }
  0x3e   :  { %461 = vmatpush.msrb.mxu0 %v2213_v9  ;;  %481 = vmatpush.msrb.mxu1 %v2215_v10  ;;  %3203 = vst [vmem:[#allocation20_spill] sm:$0xff] %v2312_v45  ;;  %v104_v52 = vld [vmem:[#allocation3 + $0x20] sm:$0xff]  ;;  %v2338_v54 = vld [vmem:[#allocation8 + $0x68] sm:$0xff]  ;;  %v2342_v55 = vld [vmem:[#allocation8 + $0x70] sm:$0xff] }
  0x3f   :  { %501 = vmatpush.msrb.mxu2 %v2220_v11  ;;  %521 = vmatpush.msrb.mxu3 %v2222_v12  ;;  %3204 = vst [vmem:[#allocation21_spill] sm:$0xff] %v2316_v46  ;;  %v2336_v53 = vld [vmem:[#allocation8 + $0x60] sm:$0xff]  ;;  %v2344_v56 = vld [vmem:[#allocation8 + $0x78] sm:$0xff]  ;;  %v2348_v58 = vld [vmem:[#allocation8 + $0x48] sm:$0xff] }
  0x40   :  { %201 = vmatmul.f32.gmra.mxu0 %v101_v13  ;;  %242 = vmatmul.f32.gmra.mxu1 %v101_v13  ;;  %3205 = vst [vmem:[#allocation22_spill] sm:$0xff] %v2318_v47  ;;  %v2346_v57 = vld [vmem:[#allocation8 + $0x40] sm:$0xff]  ;;  %v2352_v59 = vld [vmem:[#allocation8 + $0x50] sm:$0xff]  ;;  %v2354_v60 = vld [vmem:[#allocation8 + $0x58] sm:$0xff] }
  0x41   :  { %283 = vmatmul.f32.gmra.mxu2 %v101_v13  ;;  %324 = vmatmul.f32.gmra.mxu3 %v101_v13  ;;  %3206 = vst [vmem:[#allocation23_spill] sm:$0xff] %v2321_v48  ;;  %v2357_v61 = vld [vmem:[#allocation8 + $0x20] sm:$0xff]  ;;  %v2359_v62 = vld [vmem:[#allocation8 + $0x28] sm:$0xff]  ;;  %v2364_v63 = vld [vmem:[#allocation8 + $0x30] sm:$0xff] }
  0x42   :  { %462 = vmatpush.msrb.mxu0 %v2228_v14  ;;  %482 = vmatpush.msrb.mxu1 %v2230_v15  ;;  %3207 = vst [vmem:[#allocation24_spill] sm:$0xff] %v2323_v49  ;;  %v2366_v0 = vld [vmem:[#allocation8 + $0x38] sm:$0xff]  ;;  %v105_v13 = vld [vmem:[#allocation3 + $0x28] sm:$0xff] }
  0x43   :  { %502 = vmatpush.msrb.mxu2 %v2234_v16  ;;  %522 = vmatpush.msrb.mxu3 %v2236_v17  ;;  %3208 = vst [vmem:[#allocation25_spill] sm:$0xff] %v2328_v50 }
  0x44   :  { %463 = vmatpush.msrb.mxu0 %v2238_v18  ;;  %483 = vmatpush.msrb.mxu1 %v2240_v19  ;;  %3209 = vst [vmem:[#allocation26_spill] sm:$0xff] %v2330_v51 }
  0x45   :  { %503 = vmatpush.msrb.mxu2 %v2244_v20  ;;  %523 = vmatpush.msrb.mxu3 %v2246_v21  ;;  %3210 = vst [vmem:[#allocation27_spill] sm:$0xff] %v2336_v53 }
  0x46   :  { %464 = vmatpush.msrb.mxu0 %v2249_v22  ;;  %484 = vmatpush.msrb.mxu1 %v2251_v23  ;;  %3211 = vst [vmem:[#allocation28_spill] sm:$0xff] %v2338_v54 }
  0x47   :  { %504 = vmatpush.msrb.mxu2 %v2256_v24  ;;  %524 = vmatpush.msrb.mxu3 %v2258_v25  ;;  %3212 = vst [vmem:[#allocation29_spill] sm:$0xff] %v2342_v55 }
  0x48   :  { %204 = vmatmul.f32.gmra.mxu0 %v102_v26  ;;  %245 = vmatmul.f32.gmra.mxu1 %v102_v26  ;;  %3213 = vst [vmem:[#allocation30_spill] sm:$0xff] %v2344_v56 }
  0x49   :  { %286 = vmatmul.f32.gmra.mxu2 %v102_v26  ;;  %327 = vmatmul.f32.gmra.mxu3 %v102_v26  ;;  %3214 = vst [vmem:[#allocation31_spill] sm:$0xff] %v2346_v57  ;;  %v2372_v26 = vld [vmem:[#allocation8] sm:$0xff] }
  0x4a   :  { %465 = vmatpush.msrb.mxu0 %v2264_v27  ;;  %485 = vmatpush.msrb.mxu1 %v2266_v28  ;;  %3215 = vst [vmem:[#allocation32_spill] sm:$0xff] %v2348_v58 }
  0x4b   :  { %505 = vmatpush.msrb.mxu2 %v2270_v29  ;;  %525 = vmatpush.msrb.mxu3 %v2272_v30  ;;  %3216 = vst [vmem:[#allocation33_spill] sm:$0xff] %v2352_v59 }
  0x4c   :  { %466 = vmatpush.msrb.mxu0 %v2274_v31  ;;  %486 = vmatpush.msrb.mxu1 %v2276_v32  ;;  %3217 = vst [vmem:[#allocation34_spill] sm:$0xff] %v2354_v60 }
  0x4d   :  { %506 = vmatpush.msrb.mxu2 %v2280_v33  ;;  %526 = vmatpush.msrb.mxu3 %v2282_v34  ;;  %3218 = vst [vmem:[#allocation35_spill] sm:$0xff] %v2357_v61 }
  0x4e   :  { %467 = vmatpush.msrb.mxu0 %v2285_v35  ;;  %487 = vmatpush.msrb.mxu1 %v2287_v36  ;;  %3219 = vst [vmem:[#allocation36_spill] sm:$0xff] %v2359_v62 }
  0x4f   :  { %507 = vmatpush.msrb.mxu2 %v2292_v37  ;;  %527 = vmatpush.msrb.mxu3 %v2294_v38  ;;  %3220 = vst [vmem:[#allocation37_spill] sm:$0xff] %v2364_v63 }
  0x50   :  { %207 = vmatmul.f32.gmra.mxu0 %v103_v39  ;;  %248 = vmatmul.f32.gmra.mxu1 %v103_v39  ;;  %3221 = vst [vmem:[#allocation38_spill] sm:$0xff] %v2366_v0 }
  0x51   :  { %289 = vmatmul.f32.gmra.mxu2 %v103_v39  ;;  %330 = vmatmul.f32.gmra.mxu3 %v103_v39  ;;  %3222 = vst [vmem:[#allocation39_spill] sm:$0xff] %v2372_v26  ;;  %v2374_v39 = vld [vmem:[#allocation8 + $0x8] sm:$0xff] }
  0x52   :  { %468 = vmatpush.msrb.mxu0 %v2300_v40  ;;  %488 = vmatpush.msrb.mxu1 %v2302_v41  ;;  %3223 = vst [vmem:[#allocation40_spill] sm:$0xff] %v2374_v39 }
  0x53   :  { %508 = vmatpush.msrb.mxu2 %v2306_v42  ;;  %528 = vmatpush.msrb.mxu3 %v2308_v43 }
  0x54   :  { %469 = vmatpush.msrb.mxu0 %v2310_v44  ;;  %489 = vmatpush.msrb.mxu1 %v2312_v45 }
  0x55   :  { %509 = vmatpush.msrb.mxu2 %v2316_v46  ;;  %529 = vmatpush.msrb.mxu3 %v2318_v47 }
  0x56   :  { %470 = vmatpush.msrb.mxu0 %v2321_v48  ;;  %490 = vmatpush.msrb.mxu1 %v2323_v49 }
  0x57   :  { %510 = vmatpush.msrb.mxu2 %v2328_v50  ;;  %530 = vmatpush.msrb.mxu3 %v2330_v51 }
  0x58   :  { %210 = vmatmul.f32.gmra.mxu0 %v104_v52  ;;  %251 = vmatmul.f32.gmra.mxu1 %v104_v52 }
  0x59   :  { %292 = vmatmul.f32.gmra.mxu2 %v104_v52  ;;  %333 = vmatmul.f32.gmra.mxu3 %v104_v52  ;;  %v2378_v52 = vld [vmem:[#allocation8 + $0x10] sm:$0xff] }
  0x5a   :  { %471 = vmatpush.msrb.mxu0 %v2336_v53  ;;  %491 = vmatpush.msrb.mxu1 %v2338_v54  ;;  %3224 = vst [vmem:[#allocation41_spill] sm:$0xff] %v2378_v52 }
  0x5b   :  { %511 = vmatpush.msrb.mxu2 %v2342_v55  ;;  %531 = vmatpush.msrb.mxu3 %v2344_v56 }
  0x5c   :  { %472 = vmatpush.msrb.mxu0 %v2346_v57  ;;  %492 = vmatpush.msrb.mxu1 %v2348_v58  ;;  %v2380_v58 = vld [vmem:[#allocation8 + $0x18] sm:$0xff] }
  0x5d   :  { %512 = vmatpush.msrb.mxu2 %v2352_v59  ;;  %532 = vmatpush.msrb.mxu3 %v2354_v60  ;;  %3225 = vst [vmem:[#allocation42_spill] sm:$0xff] %v2380_v58 }
  0x5e   :  { %473 = vmatpush.msrb.mxu0 %v2357_v61  ;;  %493 = vmatpush.msrb.mxu1 %v2359_v62 }
  0x5f   :  { %513 = vmatpush.msrb.mxu2 %v2364_v63  ;;  %533 = vmatpush.msrb.mxu3 %v2366_v0  ;;  %v106_v0 = vld [vmem:[#allocation3 + $0x30] sm:$0xff] }
  0x60   :  { %213 = vmatmul.f32.gmra.mxu0 %v105_v13  ;;  %254 = vmatmul.f32.gmra.mxu1 %v105_v13 }
  0x61   :  { %295 = vmatmul.f32.gmra.mxu2 %v105_v13  ;;  %336 = vmatmul.f32.gmra.mxu3 %v105_v13  ;;  %v107_v13 = vld [vmem:[#allocation3 + $0x38] sm:$0xff] }
  0x62   :  { %474 = vmatpush.msrb.mxu0 %v2372_v26  ;;  %494 = vmatpush.msrb.mxu1 %v2374_v39 }
  0x63   :  { %514 = vmatpush.msrb.mxu2 %v2378_v52  ;;  %534 = vmatpush.msrb.mxu3 %v2380_v58 }
  0x64   :  { %613 = vmatpush.msra.mxu0 %v2194_v1  ;;  %633 = vmatpush.msra.mxu1 %v2196_v2 }
  0x65   :  { %653 = vmatpush.msra.mxu2 %v2198_v3  ;;  %673 = vmatpush.msra.mxu3 %v2200_v4 }
  0x66   :  { %614 = vmatpush.msra.mxu0 %v2202_v5  ;;  %634 = vmatpush.msra.mxu1 %v2204_v6 }
  0x67   :  { %654 = vmatpush.msra.mxu2 %v2208_v7  ;;  %674 = vmatpush.msra.mxu3 %v2210_v8 }
  0x68   :  { %216 = vmatmul.f32.gmra.mxu0 %v106_v0  ;;  %257 = vmatmul.f32.gmra.mxu1 %v106_v0 }
  0x69   :  { %298 = vmatmul.f32.gmra.mxu2 %v106_v0  ;;  %339 = vmatmul.f32.gmra.mxu3 %v106_v0  ;;  %v2142_v0 = vmov 0.0  }
  0x6a   :  { %615 = vmatpush.msra.mxu0 %v2213_v9  ;;  %635 = vmatpush.msra.mxu1 %v2215_v10 }
  0x6b   :  { %655 = vmatpush.msra.mxu2 %v2220_v11  ;;  %675 = vmatpush.msra.mxu3 %v2222_v12 }
  0x6c   :  { %616 = vmatpush.msra.mxu0 %v2228_v14  ;;  %636 = vmatpush.msra.mxu1 %v2230_v15 }
  0x6d   :  { %656 = vmatpush.msra.mxu2 %v2234_v16  ;;  %676 = vmatpush.msra.mxu3 %v2236_v17 }
  0x6e   :  { %617 = vmatpush.msra.mxu0 %v2238_v18  ;;  %637 = vmatpush.msra.mxu1 %v2240_v19 }
  0x6f   :  { %657 = vmatpush.msra.mxu2 %v2244_v20  ;;  %677 = vmatpush.msra.mxu3 %v2246_v21 }
  0x70   :  { %219 = vmatmul.f32.gmra.mxu0 %v107_v13  ;;  %260 = vmatmul.f32.gmra.mxu1 %v107_v13 }
  0x71   :  { %301 = vmatmul.f32.gmra.mxu2 %v107_v13  ;;  %342 = vmatmul.f32.gmra.mxu3 %v107_v13  ;;  %v3226_v13 = vld [vmem:[#allocation32_spill] sm:$0xff] }
  0x72   :  { %618 = vmatpush.msra.mxu0 %v2249_v22  ;;  %638 = vmatpush.msra.mxu1 %v2251_v23 }
  0x73   :  { %658 = vmatpush.msra.mxu2 %v2256_v24  ;;  %678 = vmatpush.msra.mxu3 %v2258_v25 }
  0x74   :  { %619 = vmatpush.msra.mxu0 %v2264_v27  ;;  %639 = vmatpush.msra.mxu1 %v2266_v28 }
  0x75   :  { %659 = vmatpush.msra.mxu2 %v2270_v29  ;;  %679 = vmatpush.msra.mxu3 %v2272_v30 }
  0x76   :  { %620 = vmatpush.msra.mxu0 %v2274_v31  ;;  %640 = vmatpush.msra.mxu1 %v2276_v32 }
  0x77   :  { %660 = vmatpush.msra.mxu2 %v2280_v33  ;;  %680 = vmatpush.msra.mxu3 %v2282_v34 }
  0x78   :  { %475 = vmatmul.f32.vlgmr.msrb.gmra.mxu0 %v2142_v0  ;;  %495 = vmatmul.f32.vlgmr.msrb.gmra.mxu1 %v2142_v0 }
  0x79   :  { %515 = vmatmul.f32.vlgmr.msrb.gmra.mxu2 %v2142_v0  ;;  %535 = vmatmul.f32.vlgmr.msrb.gmra.mxu3 %v2142_v0  ;;  %v3227_v0 = vld [vmem:[#allocation38_spill] sm:$0xff] }
  0x7a   :  { %621 = vmatpush.msra.mxu0 %v2285_v35  ;;  %641 = vmatpush.msra.mxu1 %v2287_v36 }
  0x7b   :  { %661 = vmatpush.msra.mxu2 %v2292_v37  ;;  %681 = vmatpush.msra.mxu3 %v2294_v38 }
  0x7c   :  { %622 = vmatpush.msra.mxu0 %v2300_v40  ;;  %642 = vmatpush.msra.mxu1 %v2302_v41 }
  0x7d   :  { %662 = vmatpush.msra.mxu2 %v2306_v42  ;;  %682 = vmatpush.msra.mxu3 %v2308_v43 }
  0x7e   :  { %623 = vmatpush.msra.mxu0 %v2310_v44  ;;  %643 = vmatpush.msra.mxu1 %v2312_v45 }
  0x7f   :  { %663 = vmatpush.msra.mxu2 %v2316_v46  ;;  %683 = vmatpush.msra.mxu3 %v2318_v47 }
  0x80   :  { %624 = vmatpush.msra.mxu0 %v2321_v48  ;;  %644 = vmatpush.msra.mxu1 %v2323_v49 }
  0x81   :  { %664 = vmatpush.msra.mxu2 %v2328_v50  ;;  %684 = vmatpush.msra.mxu3 %v2330_v51 }
  0x82   :  { %625 = vmatpush.msra.mxu0 %v2336_v53  ;;  %645 = vmatpush.msra.mxu1 %v2338_v54 }
  0x83   :  { %665 = vmatpush.msra.mxu2 %v2342_v55  ;;  %685 = vmatpush.msra.mxu3 %v2344_v56 }
  0x84   :  { %626 = vmatpush.msra.mxu0 %v2346_v57  ;;  %646 = vmatpush.msra.mxu1 %v3226_v13 }
  0x85   :  { %666 = vmatpush.msra.mxu2 %v2352_v59  ;;  %686 = vmatpush.msra.mxu3 %v2354_v60 }
  0x86   :  { %627 = vmatpush.msra.mxu0 %v2357_v61  ;;  %647 = vmatpush.msra.mxu1 %v2359_v62 }
  0x87   :  { %667 = vmatpush.msra.mxu2 %v2364_v63  ;;  %687 = vmatpush.msra.mxu3 %v3227_v0 }
  0x88   :  { %628 = vmatpush.msra.mxu0 %v2372_v26  ;;  %648 = vmatpush.msra.mxu1 %v2374_v39 }
  0x89   :  { %668 = vmatpush.msra.mxu2 %v2378_v52  ;;  %688 = vmatpush.msra.mxu3 %v2380_v58 }
  0x8a   :  { %767 = vmatpush.msrb.mxu0 %v2194_v1  ;;  %787 = vmatpush.msrb.mxu1 %v2196_v2 }
  0x8b   :  { %807 = vmatpush.msrb.mxu2 %v2198_v3  ;;  %827 = vmatpush.msrb.mxu3 %v2200_v4 }
  0x8c   :  { %768 = vmatpush.msrb.mxu0 %v2202_v5  ;;  %788 = vmatpush.msrb.mxu1 %v2204_v6 }
  0x8d   :  { %808 = vmatpush.msrb.mxu2 %v2208_v7  ;;  %828 = vmatpush.msrb.mxu3 %v2210_v8 }
  0x8e   :  { %769 = vmatpush.msrb.mxu0 %v2213_v9  ;;  %789 = vmatpush.msrb.mxu1 %v2215_v10 }
  0x8f   :  { %809 = vmatpush.msrb.mxu2 %v2220_v11  ;;  %829 = vmatpush.msrb.mxu3 %v2222_v12 }
  0x90   :  { %770 = vmatpush.msrb.mxu0 %v2228_v14  ;;  %790 = vmatpush.msrb.mxu1 %v2230_v15 }
  0x91   :  { %810 = vmatpush.msrb.mxu2 %v2234_v16  ;;  %830 = vmatpush.msrb.mxu3 %v2236_v17 }
  0x92   :  { %771 = vmatpush.msrb.mxu0 %v2238_v18  ;;  %791 = vmatpush.msrb.mxu1 %v2240_v19 }
  0x93   :  { %811 = vmatpush.msrb.mxu2 %v2244_v20  ;;  %831 = vmatpush.msrb.mxu3 %v2246_v21 }
  0x94   :  { %772 = vmatpush.msrb.mxu0 %v2249_v22  ;;  %792 = vmatpush.msrb.mxu1 %v2251_v23 }
  0x95   :  { %812 = vmatpush.msrb.mxu2 %v2256_v24  ;;  %832 = vmatpush.msrb.mxu3 %v2258_v25 }
  0x96   :  { %773 = vmatpush.msrb.mxu0 %v2264_v27  ;;  %793 = vmatpush.msrb.mxu1 %v2266_v28 }
  0x97   :  { %813 = vmatpush.msrb.mxu2 %v2270_v29  ;;  %833 = vmatpush.msrb.mxu3 %v2272_v30 }
  0x98   :  { %774 = vmatpush.msrb.mxu0 %v2274_v31  ;;  %794 = vmatpush.msrb.mxu1 %v2276_v32 }
  0x99   :  { %814 = vmatpush.msrb.mxu2 %v2280_v33  ;;  %834 = vmatpush.msrb.mxu3 %v2282_v34 }
  0x9a   :  { %775 = vmatpush.msrb.mxu0 %v2285_v35  ;;  %795 = vmatpush.msrb.mxu1 %v2287_v36 }
  0x9b   :  { %815 = vmatpush.msrb.mxu2 %v2292_v37  ;;  %835 = vmatpush.msrb.mxu3 %v2294_v38 }
  0x9c   :  { %776 = vmatpush.msrb.mxu0 %v2300_v40  ;;  %796 = vmatpush.msrb.mxu1 %v2302_v41 }
  0x9d   :  { %816 = vmatpush.msrb.mxu2 %v2306_v42  ;;  %836 = vmatpush.msrb.mxu3 %v2308_v43 }
  0x9e   :  { %777 = vmatpush.msrb.mxu0 %v2310_v44  ;;  %797 = vmatpush.msrb.mxu1 %v2312_v45 }
  0x9f   :  { %817 = vmatpush.msrb.mxu2 %v2316_v46  ;;  %837 = vmatpush.msrb.mxu3 %v2318_v47 }
  0xa0   :  { %778 = vmatpush.msrb.mxu0 %v2321_v48  ;;  %798 = vmatpush.msrb.mxu1 %v2323_v49 }
  0xa1   :  { %818 = vmatpush.msrb.mxu2 %v2328_v50  ;;  %838 = vmatpush.msrb.mxu3 %v2330_v51 }
  0xa2   :  { %779 = vmatpush.msrb.mxu0 %v2336_v53  ;;  %799 = vmatpush.msrb.mxu1 %v2338_v54 }
  0xa3   :  { %819 = vmatpush.msrb.mxu2 %v2342_v55  ;;  %839 = vmatpush.msrb.mxu3 %v2344_v56 }
  0xa4   :  { %780 = vmatpush.msrb.mxu0 %v2346_v57  ;;  %800 = vmatpush.msrb.mxu1 %v3226_v13  ;;  %v172_v57 = vld [vmem:[#allocation9] sm:$0xf] }
  0xa5   :  { %820 = vmatpush.msrb.mxu2 %v2352_v59  ;;  %840 = vmatpush.msrb.mxu3 %v2354_v60  ;;  %v174_v60 = vperm.slane %v172_v57, 0  ;;  %v175_v56 = vperm.slane %v172_v57, 1 }
  0xa6   :  { %781 = vmatpush.msrb.mxu0 %v2357_v61  ;;  %801 = vmatpush.msrb.mxu1 %v2359_v62 }
  0xa7   :  { %821 = vmatpush.msrb.mxu2 %v2364_v63  ;;  %841 = vmatpush.msrb.mxu3 %v3227_v0 }
  0xa8   :  { %782 = vmatpush.msrb.mxu0 %v2372_v26  ;;  %802 = vmatpush.msrb.mxu1 %v2374_v39  ;;  %v2522_v39 = vperm.slane %v172_v57, 2 }
  0xa9   :  { %822 = vmatpush.msrb.mxu2 %v2378_v52  ;;  %842 = vmatpush.msrb.mxu3 %v2380_v58  ;;  %v2524_v52 = vperm.slane %v172_v57, 3 }
  0xb5   :  { %v199_v13 = vpop.f32.mrf.mxu0  ;;  %v240_v59 = vpop.f32.mrf.mxu1 }
  0xbc   :  { %v2514_v61 = vpop.f32.mrf.mxu2  ;;  %v2516_v62 = vpop.f32.mrf.mxu3 }
  0xbd   :  { %v202_v63 = vpop.f32.mrf.mxu0  ;;  %v243_v55 = vpop.f32.mrf.mxu1 }
  0xbe   :  { %v2518_v0 = vadd.f32 %v202_v63, %v174_v60  ;;  %v2520_v26 = vadd.f32 %v243_v55, %v175_v56 }
  0xc0   :  { %3228 = vst [vmem:[#allocation43_spill] sm:$0xff] %v2518_v0 }
  0xc1   :  { %3229 = vst [vmem:[#allocation44_spill] sm:$0xff] %v2520_v26 }
  0xc4   :  { %v284_v58 = vpop.f32.mrf.mxu2  ;;  %v325_v54 = vpop.f32.mrf.mxu3 }
  0xc5   :  { %v2527_v53 = vadd.f32 %v284_v58, %v2522_v39  ;;  %v2530_v51 = vadd.f32 %v325_v54, %v2524_v52  ;;  %v205_v50 = vpop.f32.mrf.mxu0  ;;  %v246_v49 = vpop.f32.mrf.mxu1 }
  0xc6   :  { %v2532_v48 = vadd.f32 %v205_v50, %v174_v60  ;;  %v2534_v63 = vadd.f32 %v246_v49, %v175_v56 }
  0xc7   :  { %3230 = vst [vmem:[#allocation45_spill] sm:$0xff] %v2527_v53 }
  0xc8   :  { %3231 = vst [vmem:[#allocation46_spill] sm:$0xff] %v2530_v51 }
  0xc9   :  { %3232 = vst [vmem:[#allocation47_spill] sm:$0xff] %v2532_v48 }
  0xca   :  { %3233 = vst [vmem:[#allocation48_spill] sm:$0xff] %v2534_v63 }
  0xcc   :  { %v287_v55 = vpop.f32.mrf.mxu2  ;;  %v328_v26 = vpop.f32.mrf.mxu3 }
  0xcd   :  { %v2537_v0 = vadd.f32 %v287_v55, %v2522_v39  ;;  %v2540_v57 = vadd.f32 %v328_v26, %v2524_v52  ;;  %v208_v47 = vpop.f32.mrf.mxu0  ;;  %v249_v58 = vpop.f32.mrf.mxu1 }
  0xce   :  { %v2542_v53 = vadd.f32 %v208_v47, %v174_v60  ;;  %v2544_v54 = vadd.f32 %v249_v58, %v175_v56 }
  0xcf   :  { %3234 = vst [vmem:[#allocation49_spill] sm:$0xff] %v2537_v0 }
  0xd0   :  { %3235 = vst [vmem:[#allocation50_spill] sm:$0xff] %v2540_v57 }
  0xd1   :  { %3236 = vst [vmem:[#allocation51_spill] sm:$0xff] %v2542_v53 }
  0xd2   :  { %3237 = vst [vmem:[#allocation52_spill] sm:$0xff] %v2544_v54 }
  0xd4   :  { %v290_v51 = vpop.f32.mrf.mxu2  ;;  %v331_v46 = vpop.f32.mrf.mxu3 }
  0xd5   :  { %v2547_v50 = vadd.f32 %v290_v51, %v2522_v39  ;;  %v2550_v49 = vadd.f32 %v331_v46, %v2524_v52  ;;  %v211_v63 = vpop.f32.mrf.mxu0  ;;  %v252_v55 = vpop.f32.mrf.mxu1 }
  0xd6   :  { %v2552_v0 = vadd.f32 %v211_v63, %v174_v60  ;;  %v2554_v26 = vadd.f32 %v252_v55, %v175_v56 }
  0xd7   :  { %3238 = vst [vmem:[#allocation53_spill] sm:$0xff] %v2547_v50 }
  0xd8   :  { %3239 = vst [vmem:[#allocation54_spill] sm:$0xff] %v2550_v49 }
  0xd9   :  { %3240 = vst [vmem:[#allocation55_spill] sm:$0xff] %v2552_v0 }
  0xda   :  { %3241 = vst [vmem:[#allocation56_spill] sm:$0xff] %v2554_v26 }
  0xdc   :  { %v293_v57 = vpop.f32.mrf.mxu2  ;;  %v334_v48 = vpop.f32.mrf.mxu3 }
  0xdd   :  { %v2557_v47 = vadd.f32 %v293_v57, %v2522_v39  ;;  %v2560_v58 = vadd.f32 %v334_v48, %v2524_v52  ;;  %v214_v54 = vpop.f32.mrf.mxu0  ;;  %v255_v51 = vpop.f32.mrf.mxu1 }
  0xde   :  { %v2562_v50 = vadd.f32 %v214_v54, %v174_v60  ;;  %v2564_v46 = vadd.f32 %v255_v51, %v175_v56 }
  0xdf   :  { %3242 = vst [vmem:[#allocation57_spill] sm:$0xff] %v2557_v47 }
  0xe0   :  { %3243 = vst [vmem:[#allocation58_spill] sm:$0xff] %v2560_v58 }
  0xe1   :  { %3244 = vst [vmem:[#allocation59_spill] sm:$0xff] %v2562_v50  ;;  %v241_v50 = vadd.f32 %v240_v59, %v175_v56 }
  0xe2   :  { %3245 = vst [vmem:[#allocation60_spill] sm:$0xff] %v2564_v46 }
  0xe4   :  { %v296_v49 = vpop.f32.mrf.mxu2  ;;  %v337_v53 = vpop.f32.mrf.mxu3 }
  0xe5   :  { %v2567_v63 = vadd.f32 %v296_v49, %v2522_v39  ;;  %v2570_v55 = vadd.f32 %v337_v53, %v2524_v52  ;;  %v217_v26 = vpop.f32.mrf.mxu0  ;;  %v258_v57 = vpop.f32.mrf.mxu1 }
  0xe6   :  { %v2572_v47 = vadd.f32 %v217_v26, %v174_v60  ;;  %v2574_v48 = vadd.f32 %v258_v57, %v175_v56 }
  0xe7   :  { %3246 = vst [vmem:[#allocation61_spill] sm:$0xff] %v2567_v63 }
  0xe8   :  { %3247 = vst [vmem:[#allocation62_spill] sm:$0xff] %v2570_v55  ;;  %v200_v55 = vadd.f32 %v199_v13, %v174_v60 }
  0xe9   :  { %3248 = vst [vmem:[#allocation63_spill] sm:$0xff] %v2572_v47 }
  0xea   :  { %3249 = vst [vmem:[#allocation64_spill] sm:$0xff] %v2574_v48 }
  0xec   :  { %v299_v58 = vpop.f32.mrf.mxu2  ;;  %v340_v0 = vpop.f32.mrf.mxu3 }
  0xed   :  { %v2577_v54 = vadd.f32 %v299_v58, %v2522_v39  ;;  %v2580_v51 = vadd.f32 %v340_v0, %v2524_v52  ;;  %v220_v46 = vpop.f32.mrf.mxu0  ;;  %v261_v49 = vpop.f32.mrf.mxu1 }
  0xee   :  { %v2582_v63 = vadd.f32 %v220_v46, %v174_v60  ;;  %v2584_v53 = vadd.f32 %v261_v49, %v175_v56  ;;  %v282_v46 = vadd.f32 %v2514_v61, %v2522_v39 }
  0xef   :  { %3250 = vst [vmem:[#allocation65_spill] sm:$0xff] %v2577_v54 }
  0xf0   :  { %3251 = vst [vmem:[#allocation66_spill] sm:$0xff] %v2580_v51 }
  0xf1   :  { %3252 = vst [vmem:[#allocation67_spill] sm:$0xff] %v2582_v63 }
  0xf2   :  { %3253 = vst [vmem:[#allocation68_spill] sm:$0xff] %v2584_v53 }
  0xf4   :  { %v302_v26 = vpop.f32.mrf.mxu2  ;;  %v343_v47 = vpop.f32.mrf.mxu3 }
  0xf5   :  { %v2587_v57 = vadd.f32 %v302_v26, %v2522_v39  ;;  %v2590_v48 = vadd.f32 %v343_v47, %v2524_v52  ;;  %v476_v58 = vpop.f32.mrf.mxu0  ;;  %v496_v54 = vpop.f32.mrf.mxu1 }
  0xf6   :  { %v539_v0 = vadd.f32 %v476_v58, %v200_v55  ;;  %v540_v51 = vadd.f32 %v496_v54, %v241_v50  ;;  %v323_v50 = vadd.f32 %v2516_v62, %v2524_v52 }
  0xf7   :  { %3254 = vst [vmem:[#allocation69_spill] sm:$0xff] %v2587_v57 }
  0xf8   :  { %3255 = vst [vmem:[#allocation70_spill] sm:$0xff] %v2590_v48  ;;  %v1753_v45 = vmul.f32 -1.442695, %v539_v0  ;;  %v1754_v44 = vmul.f32 -1.442695, %v540_v51 }
  0xfa   :  { %1789 = vpow2.f32 %v1753_v45 }
  0xfb   :  { %1791 = vpow2.f32 %v1754_v44 }
  0xfc   :  { %v516_v56 = vpop.f32.mrf.mxu2  ;;  %v536_v48 = vpop.f32.mrf.mxu3 }
  0xfd   :  { %v541_v59 = vadd.f32 %v516_v56, %v282_v46  ;;  %v542_v51 = vadd.f32 %v536_v48, %v323_v50 }
  0xff   :  { %v1755_v60 = vmul.f32 -1.442695, %v541_v59 }
 0x100   :  { %v1790_v13 = vpop.eup %1789 }
 0x101   :  { %v1792_v49 = vpop.eup %1791  ;;  %v552_v26 = vadd.f32 1.0, %v1790_v13  ;;  %1793 = vpow2.f32 %v1755_v60 }
 0x102   :  { %v553_v47 = vadd.f32 1.0, %v1792_v49 }
 0x103   :  { %1795 = vrcp.f32 %v552_v26  ;;  %v566_v46 = vand.u32 2147483648, %v552_v26  ;;  %v564_v60 = vand.u32 2147483647, %v552_v26  ;;  %vm560_vm2 = vweird.f32 %v552_v26 }
 0x104   :  { %1797 = vrcp.f32 %v553_v47  ;;  %v581_v56 = vand.u32 2147483648, %v553_v47  ;;  %v579_v49 = vand.u32 2147483647, %v553_v47  ;;  %vm575_vm3 = vweird.f32 %v553_v47 }
 0x105   :  { %v567_v48 = vor.u32 1.1754944e-38, %v566_v46  ;;  %vm565_vm5 = vcmp.eq.f32.partialorder %v564_v60, 8.507059e+37 }
 0x106   :  { %v582_v50 = vor.u32 1.1754944e-38, %v581_v56  ;;  %vm580_vm7 = vcmp.eq.f32.partialorder %v579_v49, 8.507059e+37 }
 0x107   :  { %v1794_v55 = vpop.eup %1793 }
 0x108   :  { %v554_v45 = vadd.f32 1.0, %v1794_v55 }
 0x109   :  { %v1796_v54 = vpop.eup %1795 }
 0x10a   :  { %v1798_v61 = vpop.eup %1797  ;;  %v556_v44 = vmul.f32 %v1796_v54, %v552_v26  ;;  %1799 = vrcp.f32 %v554_v45  ;;  %vm561_vm0 = vweird.f32 %v1796_v54  ;;  %vm590_vm9 = vweird.f32 %v554_v45 }
 0x10b   :  { %v571_v39 = vmul.f32 %v1798_v61, %v553_v47  ;;  %1801 = vtanh.f32 %v542_v51  ;;  %vm576_vm1 = vweird.f32 %v1798_v61  ;;  %vm562_vm4 = vmor %vm560_vm2, %vm561_vm0  ;;  %v596_v47 = vand.u32 2147483648, %v554_v45 }
 0x10c   :  { %v557_v58 = vsub.f32 1.0, %v556_v44  ;;  %vm577_vm6 = vmor %vm575_vm3, %vm576_vm1 }
 0x10d   :  { %v572_v0 = vsub.f32 1.0, %v571_v39  ;;  %v597_v56 = vor.u32 1.1754944e-38, %v596_v47 }
 0x10e   :  { %v558_v59 = vmul.f32 %v1796_v54, %v557_v58 }
 0x10f   :  { %v573_v13 = vmul.f32 %v1798_v61, %v572_v0 }
 0x110   :  { %v1800_v57 = vpop.eup %1799  ;;  %v559_v62 = vadd.f32 %v1796_v54, %v558_v59 }
 0x111   :  { %v586_v52 = vmul.f32 %v1800_v57, %v554_v45  ;;  %v574_v55 = vadd.f32 %v1798_v61, %v573_v13  ;;  %v1802_v51 = vpop.eup %1801  ;;  %vm591_vm8 = vweird.f32 %v1800_v57 }
 0x112   :  { %v563_v44 = vsel %vm562_vm4, %v1796_v54, %v559_v62  ;;  %v594_v54 = vand.u32 2147483647, %v554_v45  ;;  %vm592_vm10 = vmor %vm590_vm9, %vm591_vm8 }
 0x113   :  { %v587_v39 = vsub.f32 1.0, %v586_v52  ;;  %v568_v58 = vsel %vm565_vm5, %v567_v48, %v563_v44  ;;  %v578_v53 = vsel %vm577_vm6, %v1798_v61, %v574_v55  ;;  %v3285_v52 = vld [vmem:[#allocation46_spill] sm:$0xff] }
 0x114   :  { %v583_v0 = vsel %vm580_vm7, %v582_v50, %v578_v53  ;;  %v602_v63 = vmul.f32 %v1802_v51, %v568_v58  ;;  %vm595_vm11 = vcmp.eq.f32.partialorder %v594_v54, 8.507059e+37 }
 0x115   :  { %v601_v43 = vmul.f32 0.0, %v583_v0  ;;  %v588_v42 = vmul.f32 %v1800_v57, %v587_v39 }
 0x117   :  { %v2596_v59 = vadd.f32 %v602_v63, %v601_v43  ;;  %v589_v26 = vadd.f32 %v1800_v57, %v588_v42 }
 0x119   :  { %1803 = vtanh.f32 %v2596_v59  ;;  %v593_v46 = vsel %vm592_vm10, %v1800_v57, %v589_v26 }
 0x11a   :  { %v598_v61 = vsel %vm595_vm11, %v597_v56, %v593_v46 }
 0x11f   :  { %v1804_v60 = vpop.eup %1803 }
 0x120   :  { %v605_v13 = vmul.f32 %v1804_v60, %v598_v61 }
 0x122   :  { %629 = vmatmul.f32.vlgmr.msra.gmra.mxu0 %v605_v13  ;;  %649 = vmatmul.f32.vlgmr.msra.gmra.mxu1 %v605_v13 }
 0x123   :  { %669 = vmatmul.f32.vlgmr.msra.gmra.mxu2 %v605_v13  ;;  %689 = vmatmul.f32.vlgmr.msra.gmra.mxu3 %v605_v13 }
 0x124   :  { %921 = vmatpush.msra.mxu0 %v2194_v1  ;;  %941 = vmatpush.msra.mxu1 %v2196_v2  ;;  %v3256_v1 = vld [vmem:[#allocation17_spill] sm:$0xff]  ;;  %v3257_v2 = vld [vmem:[#allocation18_spill] sm:$0xff] }
 0x125   :  { %961 = vmatpush.msra.mxu2 %v2198_v3  ;;  %981 = vmatpush.msra.mxu3 %v2200_v4  ;;  %v3258_v3 = vld [vmem:[#allocation19_spill] sm:$0xff]  ;;  %v3259_v4 = vld [vmem:[#allocation20_spill] sm:$0xff] }
 0x126   :  { %922 = vmatpush.msra.mxu0 %v2202_v5  ;;  %942 = vmatpush.msra.mxu1 %v2204_v6  ;;  %v3260_v5 = vld [vmem:[#allocation21_spill] sm:$0xff]  ;;  %v3261_v6 = vld [vmem:[#allocation22_spill] sm:$0xff] }
 0x127   :  { %962 = vmatpush.msra.mxu2 %v2208_v7  ;;  %982 = vmatpush.msra.mxu3 %v2210_v8  ;;  %v3262_v7 = vld [vmem:[#allocation23_spill] sm:$0xff]  ;;  %v3263_v8 = vld [vmem:[#allocation24_spill] sm:$0xff] }
 0x128   :  { %923 = vmatpush.msra.mxu0 %v2213_v9  ;;  %943 = vmatpush.msra.mxu1 %v2215_v10  ;;  %v3264_v9 = vld [vmem:[#allocation25_spill] sm:$0xff]  ;;  %v3265_v10 = vld [vmem:[#allocation26_spill] sm:$0xff] }
 0x129   :  { %963 = vmatpush.msra.mxu2 %v2220_v11  ;;  %983 = vmatpush.msra.mxu3 %v2222_v12  ;;  %v3266_v11 = vld [vmem:[#allocation27_spill] sm:$0xff]  ;;  %v3267_v12 = vld [vmem:[#allocation28_spill] sm:$0xff] }
 0x12a   :  { %924 = vmatpush.msra.mxu0 %v2228_v14  ;;  %944 = vmatpush.msra.mxu1 %v2230_v15  ;;  %v3268_v14 = vld [vmem:[#allocation29_spill] sm:$0xff]  ;;  %v3269_v15 = vld [vmem:[#allocation30_spill] sm:$0xff] }
 0x12b   :  { %964 = vmatpush.msra.mxu2 %v2234_v16  ;;  %984 = vmatpush.msra.mxu3 %v2236_v17  ;;  %v3270_v16 = vld [vmem:[#allocation31_spill] sm:$0xff]  ;;  %v3271_v17 = vld [vmem:[#allocation32_spill] sm:$0xff] }
 0x12c   :  { %925 = vmatpush.msra.mxu0 %v2238_v18  ;;  %945 = vmatpush.msra.mxu1 %v2240_v19  ;;  %v3272_v18 = vld [vmem:[#allocation33_spill] sm:$0xff]  ;;  %v3273_v19 = vld [vmem:[#allocation34_spill] sm:$0xff] }
 0x12d   :  { %965 = vmatpush.msra.mxu2 %v2244_v20  ;;  %985 = vmatpush.msra.mxu3 %v2246_v21  ;;  %v3274_v20 = vld [vmem:[#allocation35_spill] sm:$0xff]  ;;  %v3275_v21 = vld [vmem:[#allocation36_spill] sm:$0xff] }
 0x12e   :  { %926 = vmatpush.msra.mxu0 %v2249_v22  ;;  %946 = vmatpush.msra.mxu1 %v2251_v23  ;;  %v3276_v22 = vld [vmem:[#allocation37_spill] sm:$0xff]  ;;  %v3277_v23 = vld [vmem:[#allocation38_spill] sm:$0xff] }
 0x12f   :  { %966 = vmatpush.msra.mxu2 %v2256_v24  ;;  %986 = vmatpush.msra.mxu3 %v2258_v25  ;;  %v3278_v24 = vld [vmem:[#allocation39_spill] sm:$0xff]  ;;  %v3279_v25 = vld [vmem:[#allocation40_spill] sm:$0xff] }
 0x130   :  { %927 = vmatpush.msra.mxu0 %v2264_v27  ;;  %947 = vmatpush.msra.mxu1 %v2266_v28  ;;  %v3280_v27 = vld [vmem:[#allocation41_spill] sm:$0xff]  ;;  %v3281_v28 = vld [vmem:[#allocation42_spill] sm:$0xff] }
 0x131   :  { %967 = vmatpush.msra.mxu2 %v2270_v29  ;;  %987 = vmatpush.msra.mxu3 %v2272_v30 }
 0x132   :  { %928 = vmatpush.msra.mxu0 %v2274_v31  ;;  %948 = vmatpush.msra.mxu1 %v2276_v32  ;;  %v3282_v31 = vld [vmem:[#allocation43_spill] sm:$0xff] }
 0x133   :  { %968 = vmatpush.msra.mxu2 %v2280_v33  ;;  %988 = vmatpush.msra.mxu3 %v2282_v34  ;;  %v3283_v33 = vld [vmem:[#allocation44_spill] sm:$0xff] }
 0x134   :  { %929 = vmatpush.msra.mxu0 %v2285_v35  ;;  %949 = vmatpush.msra.mxu1 %v2287_v36 }
 0x135   :  { %969 = vmatpush.msra.mxu2 %v2292_v37  ;;  %989 = vmatpush.msra.mxu3 %v2294_v38  ;;  %v3284_v38 = vld [vmem:[#allocation45_spill] sm:$0xff] }
 0x136   :  { %930 = vmatpush.msra.mxu0 %v2300_v40  ;;  %950 = vmatpush.msra.mxu1 %v2302_v41 }
 0x137   :  { %970 = vmatpush.msra.mxu2 %v3256_v1  ;;  %990 = vmatpush.msra.mxu3 %v3257_v2 }
 0x138   :  { %931 = vmatpush.msra.mxu0 %v3258_v3  ;;  %951 = vmatpush.msra.mxu1 %v3259_v4 }
 0x139   :  { %971 = vmatpush.msra.mxu2 %v3260_v5  ;;  %991 = vmatpush.msra.mxu3 %v3261_v6 }
 0x13a   :  { %932 = vmatpush.msra.mxu0 %v3262_v7  ;;  %952 = vmatpush.msra.mxu1 %v3263_v8 }
 0x13b   :  { %972 = vmatpush.msra.mxu2 %v3264_v9  ;;  %992 = vmatpush.msra.mxu3 %v3265_v10 }
 0x13c   :  { %933 = vmatpush.msra.mxu0 %v3266_v11  ;;  %953 = vmatpush.msra.mxu1 %v3267_v12 }
 0x13d   :  { %973 = vmatpush.msra.mxu2 %v3268_v14  ;;  %993 = vmatpush.msra.mxu3 %v3269_v15 }
 0x13e   :  { %934 = vmatpush.msra.mxu0 %v3270_v16  ;;  %954 = vmatpush.msra.mxu1 %v3271_v17 }
 0x13f   :  { %974 = vmatpush.msra.mxu2 %v3272_v18  ;;  %994 = vmatpush.msra.mxu3 %v3273_v19 }
 0x140   :  { %935 = vmatpush.msra.mxu0 %v3274_v20  ;;  %955 = vmatpush.msra.mxu1 %v3275_v21 }
 0x141   :  { %975 = vmatpush.msra.mxu2 %v3276_v22  ;;  %995 = vmatpush.msra.mxu3 %v3277_v23 }
 0x142   :  { %936 = vmatpush.msra.mxu0 %v3278_v24  ;;  %956 = vmatpush.msra.mxu1 %v3279_v25 }
 0x143   :  { %976 = vmatpush.msra.mxu2 %v3280_v27  ;;  %996 = vmatpush.msra.mxu3 %v3281_v28 }
 0x19f   :  { %v630_v29 = vpop.f32.mrf.mxu0  ;;  %v650_v30 = vpop.f32.mrf.mxu1 }
 0x1a0   :  { %v693_v32 = vadd.f32 %v630_v29, %v3282_v31  ;;  %v694_v34 = vadd.f32 %v650_v30, %v3283_v33  ;;  %v2674_v29 = vld [vmem:[#allocation8 + $0x1e8] sm:$0xff]  ;;  %v2677_v30 = vld [vmem:[#allocation8 + $0x1f0] sm:$0xff]  ;;  %v2680_v31 = vld [vmem:[#allocation8 + $0x1f8] sm:$0xff] }
 0x1a1   :  { %v2686_v33 = vld [vmem:[#allocation8 + $0x1c8] sm:$0xff] }
 0x1a2   :  { %v1756_v35 = vmul.f32 -1.442695, %v693_v32  ;;  %v1757_v36 = vmul.f32 -1.442695, %v694_v34  ;;  %v2683_v32 = vld [vmem:[#allocation8 + $0x1c0] sm:$0xff]  ;;  %v2689_v34 = vld [vmem:[#allocation8 + $0x1d0] sm:$0xff] }
 0x1a4   :  { %1805 = vpow2.f32 %v1756_v35  ;;  %v2692_v35 = vld [vmem:[#allocation8 + $0x1d8] sm:$0xff] }
 0x1a5   :  { %1807 = vpow2.f32 %v1757_v36  ;;  %v2695_v36 = vld [vmem:[#allocation8 + $0x1a0] sm:$0xff] }
 0x1a6   :  { %v670_v37 = vpop.f32.mrf.mxu2  ;;  %v690_v57 = vpop.f32.mrf.mxu3 }
 0x1a7   :  { %v695_v40 = vadd.f32 %v670_v37, %v3284_v38  ;;  %v696_v48 = vadd.f32 %v690_v57, %v3285_v52  ;;  %v2698_v37 = vld [vmem:[#allocation8 + $0x1a8] sm:$0xff]  ;;  %v2701_v38 = vld [vmem:[#allocation8 + $0x1b0] sm:$0xff] }
 0x1a8   :  { %v2722_v57 = vld [vmem:[#allocation8 + $0x168] sm:$0xff] }
 0x1a9   :  { %v1758_v41 = vmul.f32 -1.442695, %v695_v40  ;;  %v2704_v40 = vld [vmem:[#allocation8 + $0x1b8] sm:$0xff]  ;;  %v2734_v52 = vld [vmem:[#allocation8 + $0x148] sm:$0xff] }
 0x1aa   :  { %v1806_v42 = vpop.eup %1805 }
 0x1ab   :  { %v1808_v43 = vpop.eup %1807  ;;  %v706_v63 = vadd.f32 1.0, %v1806_v42  ;;  %1809 = vpow2.f32 %v1758_v41  ;;  %v2707_v41 = vld [vmem:[#allocation8 + $0x180] sm:$0xff]  ;;  %v2710_v42 = vld [vmem:[#allocation8 + $0x188] sm:$0xff] }
 0x1ac   :  { %v707_v53 = vadd.f32 1.0, %v1808_v43  ;;  %v2713_v43 = vld [vmem:[#allocation8 + $0x190] sm:$0xff] }
 0x1ad   :  { %1811 = vrcp.f32 %v706_v63  ;;  %v720_v58 = vand.u32 2147483648, %v706_v63  ;;  %v718_v47 = vand.u32 2147483647, %v706_v63  ;;  %vm714_vm14 = vweird.f32 %v706_v63 }
 0x1ae   :  { %1813 = vrcp.f32 %v707_v53  ;;  %v735_v0 = vand.u32 2147483648, %v707_v53  ;;  %v733_v46 = vand.u32 2147483647, %v707_v53  ;;  %vm729_vm15 = vweird.f32 %v707_v53 }
 0x1af   :  { %v721_v13 = vor.u32 1.1754944e-38, %v720_v58  ;;  %vm719_vm2 = vcmp.eq.f32.partialorder %v718_v47, 8.507059e+37  ;;  %v2755_v58 = vld [vmem:[#allocation8 + $0x100] sm:$0xff]  ;;  %v2764_v47 = vld [vmem:[#allocation8 + $0x118] sm:$0xff] }
 0x1b0   :  { %v736_v2 = vor.u32 1.1754944e-38, %v735_v0  ;;  %vm734_vm3 = vcmp.eq.f32.partialorder %v733_v46, 8.507059e+37  ;;  %v2758_v0 = vld [vmem:[#allocation8 + $0x108] sm:$0xff] }
 0x1b1   :  { %v1810_v45 = vpop.eup %1809  ;;  %v2770_v46 = vld [vmem:[#allocation8 + $0xe8] sm:$0xff] }
 0x1b2   :  { %v708_v49 = vadd.f32 1.0, %v1810_v45  ;;  %v2725_v45 = vld [vmem:[#allocation8 + $0x170] sm:$0xff] }
 0x1b3   :  { %v1812_v62 = vpop.eup %1811 }
 0x1b4   :  { %v1814_v55 = vpop.eup %1813  ;;  %v710_v50 = vmul.f32 %v1812_v62, %v706_v63  ;;  %1815 = vrcp.f32 %v708_v49  ;;  %vm715_vm12 = vweird.f32 %v1812_v62  ;;  %v750_v15 = vand.u32 2147483648, %v708_v49  ;;  %v2716_v63 = vld [vmem:[#allocation8 + $0x198] sm:$0xff] }
 0x1b5   :  { %v725_v44 = vmul.f32 %v1814_v55, %v707_v53  ;;  %1817 = vtanh.f32 %v696_v48  ;;  %vm730_vm13 = vweird.f32 %v1814_v55  ;;  %vm716_vm0 = vmor %vm714_vm14, %vm715_vm12  ;;  %vm744_vm5 = vweird.f32 %v708_v49  ;;  %v2719_v53 = vld [vmem:[#allocation8 + $0x160] sm:$0xff]  ;;  %v2737_v48 = vld [vmem:[#allocation8 + $0x150] sm:$0xff] }
 0x1b6   :  { %v711_v51 = vsub.f32 1.0, %v710_v50  ;;  %vm731_vm1 = vmor %vm729_vm15, %vm730_vm13  ;;  %v748_v16 = vand.u32 2147483647, %v708_v49  ;;  %v751_v18 = vor.u32 1.1754944e-38, %v750_v15  ;;  %v2743_v50 = vld [vmem:[#allocation8 + $0x120] sm:$0xff]  ;;  %v2821_v15 = vld [vmem:[#allocation8 + $0x70] sm:$0xff] }
 0x1b7   :  { %v726_v39 = vsub.f32 1.0, %v725_v44  ;;  %v2746_v44 = vld [vmem:[#allocation8 + $0x128] sm:$0xff]  ;;  %3298 = vst [vmem:[#allocation29_spill] sm:$0xff] %v2821_v15 }
 0x1b8   :  { %v712_v26 = vmul.f32 %v1812_v62, %v711_v51  ;;  %vm749_vm7 = vcmp.eq.f32.partialorder %v748_v16, 8.507059e+37  ;;  %v2749_v51 = vld [vmem:[#allocation8 + $0x130] sm:$0xff]  ;;  %v2824_v16 = vld [vmem:[#allocation8 + $0x78] sm:$0xff] }
 0x1b9   :  { %v727_v54 = vmul.f32 %v1814_v55, %v726_v39  ;;  %v2752_v39 = vld [vmem:[#allocation8 + $0x138] sm:$0xff]  ;;  %3299 = vst [vmem:[#allocation30_spill] sm:$0xff] %v2824_v16 }
 0x1ba   :  { %v1816_v56 = vpop.eup %1815  ;;  %v713_v60 = vadd.f32 %v1812_v62, %v712_v26  ;;  %v2761_v26 = vld [vmem:[#allocation8 + $0x110] sm:$0xff] }
 0x1bb   :  { %v740_v61 = vmul.f32 %v1816_v56, %v708_v49  ;;  %v728_v1 = vadd.f32 %v1814_v55, %v727_v54  ;;  %v1818_v4 = vpop.eup %1817  ;;  %vm745_vm4 = vweird.f32 %v1816_v56  ;;  %v2728_v49 = vld [vmem:[#allocation8 + $0x178] sm:$0xff]  ;;  %v2767_v54 = vld [vmem:[#allocation8 + $0xe0] sm:$0xff] }
 0x1bc   :  { %v717_v3 = vsel %vm716_vm0, %v1812_v62, %v713_v60  ;;  %vm746_vm6 = vmor %vm744_vm5, %vm745_vm4  ;;  %v2731_v62 = vld [vmem:[#allocation8 + $0x140] sm:$0xff]  ;;  %v2776_v60 = vld [vmem:[#allocation8 + $0xf8] sm:$0xff] }
 0x1bd   :  { %v741_v5 = vsub.f32 1.0, %v740_v61  ;;  %v722_v6 = vsel %vm719_vm2, %v721_v13, %v717_v3  ;;  %v732_v7 = vsel %vm731_vm1, %v1814_v55, %v728_v1  ;;  %v2740_v55 = vld [vmem:[#allocation8 + $0x158] sm:$0xff]  ;;  %v2779_v61 = vld [vmem:[#allocation8 + $0xc0] sm:$0xff]  ;;  %v2782_v13 = vld [vmem:[#allocation8 + $0xc8] sm:$0xff] }
 0x1be   :  { %v737_v8 = vsel %vm734_vm3, %v736_v2, %v732_v7  ;;  %v756_v9 = vmul.f32 %v1818_v4, %v722_v6  ;;  %v2785_v1 = vld [vmem:[#allocation8 + $0xd0] sm:$0xff]  ;;  %v2788_v2 = vld [vmem:[#allocation8 + $0xd8] sm:$0xff]  ;;  %v2791_v3 = vld [vmem:[#allocation8 + $0xa0] sm:$0xff] }
 0x1bf   :  { %v755_v10 = vmul.f32 %v737_v8, %v2596_v59  ;;  %v742_v11 = vmul.f32 %v1816_v56, %v741_v5  ;;  %v2671_v59 = vld [vmem:[#allocation8 + $0x1e0] sm:$0xff]  ;;  %3286 = vst [vmem:[#allocation17_spill] sm:$0xff] %v2785_v1  ;;  %v2794_v4 = vld [vmem:[#allocation8 + $0xa8] sm:$0xff]  ;;  %v2797_v5 = vld [vmem:[#allocation8 + $0xb0] sm:$0xff] }
 0x1c0   :  { %3287 = vst [vmem:[#allocation18_spill] sm:$0xff] %v2788_v2  ;;  %v2800_v6 = vld [vmem:[#allocation8 + $0xb8] sm:$0xff]  ;;  %v2803_v7 = vld [vmem:[#allocation8 + $0x80] sm:$0xff]  ;;  %v2806_v8 = vld [vmem:[#allocation8 + $0x88] sm:$0xff] }
 0x1c1   :  { %v2668_v12 = vadd.f32 %v756_v9, %v755_v10  ;;  %v743_v14 = vadd.f32 %v1816_v56, %v742_v11  ;;  %3288 = vst [vmem:[#allocation19_spill] sm:$0xff] %v2791_v3  ;;  %v2809_v9 = vld [vmem:[#allocation8 + $0x90] sm:$0xff]  ;;  %v2812_v10 = vld [vmem:[#allocation8 + $0x98] sm:$0xff]  ;;  %v2815_v11 = vld [vmem:[#allocation8 + $0x60] sm:$0xff] }
 0x1c2   :  { %3289 = vst [vmem:[#allocation20_spill] sm:$0xff] %v2794_v4 }
 0x1c3   :  { %1819 = vtanh.f32 %v2668_v12  ;;  %v747_v17 = vsel %vm746_vm6, %v1816_v56, %v743_v14  ;;  %v2773_v56 = vld [vmem:[#allocation8 + $0xf0] sm:$0xff]  ;;  %3290 = vst [vmem:[#allocation21_spill] sm:$0xff] %v2797_v5  ;;  %v2818_v14 = vld [vmem:[#allocation8 + $0x68] sm:$0xff] }
 0x1c4   :  { %v752_v20 = vsel %vm749_vm7, %v751_v18, %v747_v17  ;;  %3291 = vst [vmem:[#allocation22_spill] sm:$0xff] %v2800_v6  ;;  %v2827_v17 = vld [vmem:[#allocation8 + $0x40] sm:$0xff]  ;;  %v2830_v18 = vld [vmem:[#allocation8 + $0x48] sm:$0xff] }
 0x1c5   :  { %3292 = vst [vmem:[#allocation23_spill] sm:$0xff] %v2803_v7 }
 0x1c6   :  { %3293 = vst [vmem:[#allocation24_spill] sm:$0xff] %v2806_v8 }
 0x1c7   :  { %3294 = vst [vmem:[#allocation25_spill] sm:$0xff] %v2809_v9 }
 0x1c8   :  { %3295 = vst [vmem:[#allocation26_spill] sm:$0xff] %v2812_v10 }
 0x1c9   :  { %v1820_v19 = vpop.eup %1819  ;;  %3296 = vst [vmem:[#allocation27_spill] sm:$0xff] %v2815_v11 }
 0x1ca   :  { %v759_v21 = vmul.f32 %v1820_v19, %v752_v20  ;;  %3297 = vst [vmem:[#allocation28_spill] sm:$0xff] %v2818_v14  ;;  %v2833_v19 = vld [vmem:[#allocation8 + $0x50] sm:$0xff]  ;;  %v2836_v20 = vld [vmem:[#allocation8 + $0x58] sm:$0xff] }
 0x1cb   :  { %3300 = vst [vmem:[#allocation31_spill] sm:$0xff] %v2827_v17 }
 0x1cc   :  { %783 = vmatmul.f32.vlgmr.msrb.gmra.mxu0 %v759_v21  ;;  %803 = vmatmul.f32.vlgmr.msrb.gmra.mxu1 %v759_v21  ;;  %3301 = vst [vmem:[#allocation32_spill] sm:$0xff] %v2830_v18 }
 0x1cd   :  { %823 = vmatmul.f32.vlgmr.msrb.gmra.mxu2 %v759_v21  ;;  %843 = vmatmul.f32.vlgmr.msrb.gmra.mxu3 %v759_v21  ;;  %3302 = vst [vmem:[#allocation33_spill] sm:$0xff] %v2833_v19  ;;  %v2839_v21 = vld [vmem:[#allocation8 + $0x20] sm:$0xff] }
 0x1ce   :  { %1075 = vmatpush.msrb.mxu0 %v2671_v59  ;;  %1095 = vmatpush.msrb.mxu1 %v2674_v29  ;;  %3303 = vst [vmem:[#allocation34_spill] sm:$0xff] %v2836_v20 }
 0x1cf   :  { %1115 = vmatpush.msrb.mxu2 %v2677_v30  ;;  %1135 = vmatpush.msrb.mxu3 %v2680_v31  ;;  %3304 = vst [vmem:[#allocation35_spill] sm:$0xff] %v2839_v21 }
 0x1d0   :  { %1076 = vmatpush.msrb.mxu0 %v2683_v32  ;;  %1096 = vmatpush.msrb.mxu1 %v2686_v33 }
 0x1d1   :  { %1116 = vmatpush.msrb.mxu2 %v2689_v34  ;;  %1136 = vmatpush.msrb.mxu3 %v2692_v35 }
 0x1d2   :  { %1077 = vmatpush.msrb.mxu0 %v2695_v36  ;;  %1097 = vmatpush.msrb.mxu1 %v2698_v37 }
 0x1d3   :  { %1117 = vmatpush.msrb.mxu2 %v2701_v38  ;;  %1137 = vmatpush.msrb.mxu3 %v2704_v40 }
 0x1d4   :  { %1078 = vmatpush.msrb.mxu0 %v2707_v41  ;;  %1098 = vmatpush.msrb.mxu1 %v2710_v42 }
 0x1d5   :  { %1118 = vmatpush.msrb.mxu2 %v2713_v43  ;;  %1138 = vmatpush.msrb.mxu3 %v2716_v63 }
 0x1d6   :  { %1079 = vmatpush.msrb.mxu0 %v2719_v53  ;;  %1099 = vmatpush.msrb.mxu1 %v2722_v57 }
 0x1d7   :  { %1119 = vmatpush.msrb.mxu2 %v2725_v45  ;;  %1139 = vmatpush.msrb.mxu3 %v2728_v49 }
 0x1d8   :  { %1080 = vmatpush.msrb.mxu0 %v2731_v62  ;;  %1100 = vmatpush.msrb.mxu1 %v2734_v52 }
 0x1d9   :  { %1120 = vmatpush.msrb.mxu2 %v2737_v48  ;;  %1140 = vmatpush.msrb.mxu3 %v2740_v55 }
 0x1da   :  { %1081 = vmatpush.msrb.mxu0 %v2743_v50  ;;  %1101 = vmatpush.msrb.mxu1 %v2746_v44 }
 0x1db   :  { %1121 = vmatpush.msrb.mxu2 %v2749_v51  ;;  %1141 = vmatpush.msrb.mxu3 %v2752_v39 }
 0x1dc   :  { %1082 = vmatpush.msrb.mxu0 %v2755_v58  ;;  %1102 = vmatpush.msrb.mxu1 %v2758_v0 }
 0x1dd   :  { %1122 = vmatpush.msrb.mxu2 %v2761_v26  ;;  %1142 = vmatpush.msrb.mxu3 %v2764_v47 }
 0x1de   :  { %1083 = vmatpush.msrb.mxu0 %v2767_v54  ;;  %1103 = vmatpush.msrb.mxu1 %v2770_v46 }
 0x1df   :  { %1123 = vmatpush.msrb.mxu2 %v2773_v56  ;;  %1143 = vmatpush.msrb.mxu3 %v2776_v60 }
 0x1e0   :  { %1084 = vmatpush.msrb.mxu0 %v2779_v61  ;;  %1104 = vmatpush.msrb.mxu1 %v2782_v13 }
 0x1e1   :  { %1124 = vmatpush.msrb.mxu2 %v2785_v1  ;;  %1144 = vmatpush.msrb.mxu3 %v2788_v2 }
 0x1e2   :  { %1085 = vmatpush.msrb.mxu0 %v2791_v3  ;;  %1105 = vmatpush.msrb.mxu1 %v2794_v4 }
 0x1e3   :  { %1125 = vmatpush.msrb.mxu2 %v2797_v5  ;;  %1145 = vmatpush.msrb.mxu3 %v2800_v6 }
 0x1e4   :  { %1086 = vmatpush.msrb.mxu0 %v2803_v7  ;;  %1106 = vmatpush.msrb.mxu1 %v2806_v8 }
 0x1e5   :  { %1126 = vmatpush.msrb.mxu2 %v2809_v9  ;;  %1146 = vmatpush.msrb.mxu3 %v2812_v10 }
 0x1e6   :  { %1087 = vmatpush.msrb.mxu0 %v2815_v11  ;;  %1107 = vmatpush.msrb.mxu1 %v2818_v14 }
 0x1e7   :  { %1127 = vmatpush.msrb.mxu2 %v2821_v15  ;;  %1147 = vmatpush.msrb.mxu3 %v2824_v16  ;;  %v2842_v16 = vld [vmem:[#allocation8 + $0x28] sm:$0xff] }
 0x1e8   :  { %1088 = vmatpush.msrb.mxu0 %v2827_v17  ;;  %1108 = vmatpush.msrb.mxu1 %v2830_v18  ;;  %3305 = vst [vmem:[#allocation36_spill] sm:$0xff] %v2842_v16  ;;  %v3306_v18 = vld [vmem:[#allocation47_spill] sm:$0xff]  ;;  %v3307_v17 = vld [vmem:[#allocation48_spill] sm:$0xff] }
 0x1e9   :  { %1128 = vmatpush.msrb.mxu2 %v2833_v19  ;;  %1148 = vmatpush.msrb.mxu3 %v2836_v20 }
 0x1ea   :  { %1089 = vmatpush.msrb.mxu0 %v2839_v21  ;;  %1109 = vmatpush.msrb.mxu1 %v2842_v16 }
 0x1eb   :  { %1129 = vmatpush.msrb.mxu2 %v3276_v22  ;;  %1149 = vmatpush.msrb.mxu3 %v3277_v23  ;;  %v3308_v23 = vld [vmem:[#allocation49_spill] sm:$0xff] }
 0x1ec   :  { %1090 = vmatpush.msrb.mxu0 %v3278_v24  ;;  %1110 = vmatpush.msrb.mxu1 %v3279_v25 }
 0x1ed   :  { %1130 = vmatpush.msrb.mxu2 %v3280_v27  ;;  %1150 = vmatpush.msrb.mxu3 %v3281_v28 }
 0x249   :  { %v784_v20 = vpop.f32.mrf.mxu0  ;;  %v804_v19 = vpop.f32.mrf.mxu1 }
 0x24a   :  { %v847_v21 = vadd.f32 %v784_v20, %v3306_v18  ;;  %v848_v15 = vadd.f32 %v804_v19, %v3307_v17  ;;  %v3309_v17 = vld [vmem:[#allocation50_spill] sm:$0xff] }
 0x24c   :  { %v1759_v14 = vmul.f32 -1.442695, %v847_v21  ;;  %v1760_v16 = vmul.f32 -1.442695, %v848_v15 }
 0x24e   :  { %1821 = vpow2.f32 %v1759_v14 }
 0x24f   :  { %1823 = vpow2.f32 %v1760_v16 }
 0x250   :  { %v824_v22 = vpop.f32.mrf.mxu2  ;;  %v844_v28 = vpop.f32.mrf.mxu3 }
 0x251   :  { %v849_v11 = vadd.f32 %v824_v22, %v3308_v23  ;;  %v850_v19 = vadd.f32 %v844_v28, %v3309_v17 }
 0x253   :  { %v1761_v24 = vmul.f32 -1.442695, %v849_v11 }
 0x254   :  { %v1822_v10 = vpop.eup %1821 }
 0x255   :  { %v1824_v25 = vpop.eup %1823  ;;  %v860_v9 = vadd.f32 1.0, %v1822_v10  ;;  %1825 = vpow2.f32 %v1761_v24 }
 0x256   :  { %v861_v27 = vadd.f32 1.0, %v1824_v25 }
 0x257   :  { %1827 = vrcp.f32 %v860_v9  ;;  %v874_v11 = vand.u32 2147483648, %v860_v9  ;;  %v872_v24 = vand.u32 2147483647, %v860_v9  ;;  %vm868_vm10 = vweird.f32 %v860_v9 }
 0x258   :  { %1829 = vrcp.f32 %v861_v27  ;;  %v889_v23 = vand.u32 2147483648, %v861_v27  ;;  %v887_v7 = vand.u32 2147483647, %v861_v27  ;;  %vm883_vm11 = vweird.f32 %v861_v27 }
 0x259   :  { %v875_v17 = vor.u32 1.1754944e-38, %v874_v11  ;;  %vm873_vm14 = vcmp.eq.f32.partialorder %v872_v24, 8.507059e+37 }
 0x25a   :  { %vm888_vm15 = vcmp.eq.f32.partialorder %v887_v7, 8.507059e+37 }
 0x25b   :  { %v1826_v8 = vpop.eup %1825 }
 0x25c   :  { %v862_v18 = vadd.f32 1.0, %v1826_v8 }
 0x25d   :  { %v1828_v20 = vpop.eup %1827 }
 0x25e   :  { %v1830_v15 = vpop.eup %1829  ;;  %v864_v14 = vmul.f32 %v1828_v20, %v860_v9  ;;  %1831 = vrcp.f32 %v862_v18  ;;  %vm869_vm8 = vweird.f32 %v1828_v20  ;;  %v904_v11 = vand.u32 2147483648, %v862_v18 }
 0x25f   :  { %v879_v16 = vmul.f32 %v1830_v15, %v861_v27  ;;  %1833 = vtanh.f32 %v850_v19  ;;  %vm884_vm9 = vweird.f32 %v1830_v15  ;;  %vm870_vm12 = vmor %vm868_vm10, %vm869_vm8  ;;  %vm898_vm1 = vweird.f32 %v862_v18 }
 0x260   :  { %v865_v21 = vsub.f32 1.0, %v864_v14  ;;  %vm885_vm13 = vmor %vm883_vm11, %vm884_vm9  ;;  %v890_v14 = vor.u32 1.1754944e-38, %v889_v23  ;;  %v905_v24 = vor.u32 1.1754944e-38, %v904_v11  ;;  %v3328_v11 = vld [vmem:[#allocation35_spill] sm:$0xff] }
 0x261   :  { %v880_v22 = vsub.f32 1.0, %v879_v16 }
 0x262   :  { %v866_v10 = vmul.f32 %v1828_v20, %v865_v21 }
 0x263   :  { %v881_v25 = vmul.f32 %v1830_v15, %v880_v22 }
 0x264   :  { %v1832_v6 = vpop.eup %1831  ;;  %v867_v8 = vadd.f32 %v1828_v20, %v866_v10 }
 0x265   :  { %v894_v28 = vmul.f32 %v1832_v6, %v862_v18  ;;  %v882_v5 = vadd.f32 %v1830_v15, %v881_v25  ;;  %v1834_v19 = vpop.eup %1833  ;;  %vm899_vm0 = vweird.f32 %v1832_v6  ;;  %v3317_v25 = vld [vmem:[#allocation24_spill] sm:$0xff] }
 0x266   :  { %v871_v16 = vsel %vm870_vm12, %v1828_v20, %v867_v8  ;;  %v902_v20 = vand.u32 2147483647, %v862_v18  ;;  %vm900_vm2 = vmor %vm898_vm1, %vm899_vm0  ;;  %v3315_v18 = vld [vmem:[#allocation22_spill] sm:$0xff]  ;;  %v3318_v8 = vld [vmem:[#allocation25_spill] sm:$0xff] }
 0x267   :  { %v895_v4 = vsub.f32 1.0, %v894_v28  ;;  %v876_v21 = vsel %vm873_vm14, %v875_v17, %v871_v16  ;;  %v886_v3 = vsel %vm885_vm13, %v1830_v15, %v882_v5  ;;  %v3316_v15 = vld [vmem:[#allocation23_spill] sm:$0xff]  ;;  %v3319_v28 = vld [vmem:[#allocation26_spill] sm:$0xff]  ;;  %v3322_v16 = vld [vmem:[#allocation29_spill] sm:$0xff] }
 0x268   :  { %v891_v22 = vsel %vm888_vm15, %v890_v14, %v886_v3  ;;  %v910_v2 = vmul.f32 %v1834_v19, %v876_v21  ;;  %vm903_vm3 = vcmp.eq.f32.partialorder %v902_v20, 8.507059e+37  ;;  %v3320_v17 = vld [vmem:[#allocation27_spill] sm:$0xff]  ;;  %v3321_v14 = vld [vmem:[#allocation28_spill] sm:$0xff]  ;;  %v3323_v19 = vld [vmem:[#allocation30_spill] sm:$0xff] }
 0x269   :  { %v909_v1 = vmul.f32 %v891_v22, %v2668_v12  ;;  %v896_v10 = vmul.f32 %v1832_v6, %v895_v4  ;;  %v3310_v12 = vld [vmem:[#allocation17_spill] sm:$0xff]  ;;  %v3313_v4 = vld [vmem:[#allocation20_spill] sm:$0xff]  ;;  %v3324_v21 = vld [vmem:[#allocation31_spill] sm:$0xff] }
 0x26a   :  { %v3325_v22 = vld [vmem:[#allocation32_spill] sm:$0xff] }
 0x26b   :  { %v2856_v9 = vadd.f32 %v910_v2, %v909_v1  ;;  %v897_v27 = vadd.f32 %v1832_v6, %v896_v10  ;;  %v3311_v1 = vld [vmem:[#allocation18_spill] sm:$0xff]  ;;  %v3312_v2 = vld [vmem:[#allocation19_spill] sm:$0xff]  ;;  %v3326_v10 = vld [vmem:[#allocation33_spill] sm:$0xff] }
 0x26c   :  { %v3329_v20 = vld [vmem:[#allocation36_spill] sm:$0xff] }
 0x26d   :  { %1835 = vtanh.f32 %v2856_v9  ;;  %v901_v23 = vsel %vm900_vm2, %v1832_v6, %v897_v27  ;;  %v3314_v6 = vld [vmem:[#allocation21_spill] sm:$0xff]  ;;  %v3327_v27 = vld [vmem:[#allocation34_spill] sm:$0xff] }
 0x26e   :  { %v906_v7 = vsel %vm903_vm3, %v905_v24, %v901_v23  ;;  %v2917_v23 = vld [vmem:[#allocation8 + $0x30] sm:$0xff]  ;;  %v2920_v24 = vld [vmem:[#allocation8 + $0x38] sm:$0xff] }
 0x26f   :  { %3330 = vst [vmem:[#allocation37_spill] sm:$0xff] %v2917_v23 }
 0x270   :  { %3331 = vst [vmem:[#allocation38_spill] sm:$0xff] %v2920_v24 }
 0x273   :  { %v1836_v5 = vpop.eup %1835 }
 0x274   :  { %v913_v3 = vmul.f32 %v1836_v5, %v906_v7  ;;  %v2923_v5 = vld [vmem:[#allocation8] sm:$0xff]  ;;  %v2926_v7 = vld [vmem:[#allocation8 + $0x8] sm:$0xff] }
 0x275   :  { %3332 = vst [vmem:[#allocation39_spill] sm:$0xff] %v2923_v5 }
 0x276   :  { %937 = vmatmul.f32.vlgmr.msra.gmra.mxu0 %v913_v3  ;;  %957 = vmatmul.f32.vlgmr.msra.gmra.mxu1 %v913_v3  ;;  %3333 = vst [vmem:[#allocation40_spill] sm:$0xff] %v2926_v7 }
 0x277   :  { %977 = vmatmul.f32.vlgmr.msra.gmra.mxu2 %v913_v3  ;;  %997 = vmatmul.f32.vlgmr.msra.gmra.mxu3 %v913_v3  ;;  %v2929_v3 = vld [vmem:[#allocation8 + $0x10] sm:$0xff] }
 0x278   :  { %1229 = vmatpush.msra.mxu0 %v2671_v59  ;;  %1249 = vmatpush.msra.mxu1 %v2674_v29  ;;  %3334 = vst [vmem:[#allocation41_spill] sm:$0xff] %v2929_v3 }
 0x279   :  { %1269 = vmatpush.msra.mxu2 %v2677_v30  ;;  %1289 = vmatpush.msra.mxu3 %v2680_v31 }
 0x27a   :  { %1230 = vmatpush.msra.mxu0 %v2683_v32  ;;  %1250 = vmatpush.msra.mxu1 %v2686_v33 }
 0x27b   :  { %1270 = vmatpush.msra.mxu2 %v2689_v34  ;;  %1290 = vmatpush.msra.mxu3 %v2692_v35 }
 0x27c   :  { %1231 = vmatpush.msra.mxu0 %v2695_v36  ;;  %1251 = vmatpush.msra.mxu1 %v2698_v37 }
 0x27d   :  { %1271 = vmatpush.msra.mxu2 %v2701_v38  ;;  %1291 = vmatpush.msra.mxu3 %v2704_v40 }
 0x27e   :  { %1232 = vmatpush.msra.mxu0 %v2707_v41  ;;  %1252 = vmatpush.msra.mxu1 %v2710_v42 }
 0x27f   :  { %1272 = vmatpush.msra.mxu2 %v2713_v43  ;;  %1292 = vmatpush.msra.mxu3 %v2716_v63 }
 0x280   :  { %1233 = vmatpush.msra.mxu0 %v2719_v53  ;;  %1253 = vmatpush.msra.mxu1 %v2722_v57 }
 0x281   :  { %1273 = vmatpush.msra.mxu2 %v2725_v45  ;;  %1293 = vmatpush.msra.mxu3 %v2728_v49 }
 0x282   :  { %1234 = vmatpush.msra.mxu0 %v2731_v62  ;;  %1254 = vmatpush.msra.mxu1 %v2734_v52 }
 0x283   :  { %1274 = vmatpush.msra.mxu2 %v2737_v48  ;;  %1294 = vmatpush.msra.mxu3 %v2740_v55 }
 0x284   :  { %1235 = vmatpush.msra.mxu0 %v2743_v50  ;;  %1255 = vmatpush.msra.mxu1 %v2746_v44 }
 0x285   :  { %1275 = vmatpush.msra.mxu2 %v2749_v51  ;;  %1295 = vmatpush.msra.mxu3 %v2752_v39 }
 0x286   :  { %1236 = vmatpush.msra.mxu0 %v2755_v58  ;;  %1256 = vmatpush.msra.mxu1 %v2758_v0 }
 0x287   :  { %1276 = vmatpush.msra.mxu2 %v2761_v26  ;;  %1296 = vmatpush.msra.mxu3 %v2764_v47 }
 0x288   :  { %1237 = vmatpush.msra.mxu0 %v2767_v54  ;;  %1257 = vmatpush.msra.mxu1 %v2770_v46 }
 0x289   :  { %1277 = vmatpush.msra.mxu2 %v2773_v56  ;;  %1297 = vmatpush.msra.mxu3 %v2776_v60 }
 0x28a   :  { %1238 = vmatpush.msra.mxu0 %v2779_v61  ;;  %1258 = vmatpush.msra.mxu1 %v2782_v13 }
 0x28b   :  { %1278 = vmatpush.msra.mxu2 %v3310_v12  ;;  %1298 = vmatpush.msra.mxu3 %v3311_v1 }
 0x28c   :  { %1239 = vmatpush.msra.mxu0 %v3312_v2  ;;  %1259 = vmatpush.msra.mxu1 %v3313_v4 }
 0x28d   :  { %1279 = vmatpush.msra.mxu2 %v3314_v6  ;;  %1299 = vmatpush.msra.mxu3 %v3315_v18 }
 0x28e   :  { %1240 = vmatpush.msra.mxu0 %v3316_v15  ;;  %1260 = vmatpush.msra.mxu1 %v3317_v25 }
 0x28f   :  { %1280 = vmatpush.msra.mxu2 %v3318_v8  ;;  %1300 = vmatpush.msra.mxu3 %v3319_v28 }
 0x290   :  { %1241 = vmatpush.msra.mxu0 %v3320_v17  ;;  %1261 = vmatpush.msra.mxu1 %v3321_v14 }
 0x291   :  { %1281 = vmatpush.msra.mxu2 %v3322_v16  ;;  %1301 = vmatpush.msra.mxu3 %v3323_v19 }
 0x292   :  { %1242 = vmatpush.msra.mxu0 %v3324_v21  ;;  %1262 = vmatpush.msra.mxu1 %v3325_v22 }
 0x293   :  { %1282 = vmatpush.msra.mxu2 %v3326_v10  ;;  %1302 = vmatpush.msra.mxu3 %v3327_v27  ;;  %v3336_v27 = vld [vmem:[#allocation51_spill] sm:$0xff]  ;;  %v3337_v10 = vld [vmem:[#allocation52_spill] sm:$0xff] }
 0x294   :  { %1243 = vmatpush.msra.mxu0 %v3328_v11  ;;  %1263 = vmatpush.msra.mxu1 %v3329_v20  ;;  %v2932_v20 = vld [vmem:[#allocation8 + $0x18] sm:$0xff] }
 0x295   :  { %1283 = vmatpush.msra.mxu2 %v2917_v23  ;;  %1303 = vmatpush.msra.mxu3 %v2920_v24  ;;  %3335 = vst [vmem:[#allocation42_spill] sm:$0xff] %v2932_v20 }
 0x296   :  { %1244 = vmatpush.msra.mxu0 %v2923_v5  ;;  %1264 = vmatpush.msra.mxu1 %v2926_v7  ;;  %v3338_v7 = vld [vmem:[#allocation53_spill] sm:$0xff] }
 0x297   :  { %1284 = vmatpush.msra.mxu2 %v2929_v3  ;;  %1304 = vmatpush.msra.mxu3 %v2932_v20 }
 0x2f3   :  { %v938_v23 = vpop.f32.mrf.mxu0  ;;  %v958_v11 = vpop.f32.mrf.mxu1 }
 0x2f4   :  { %v1001_v24 = vadd.f32 %v938_v23, %v3336_v27  ;;  %v1002_v22 = vadd.f32 %v958_v11, %v3337_v10  ;;  %v3339_v10 = vld [vmem:[#allocation54_spill] sm:$0xff] }
 0x2f6   :  { %v1762_v21 = vmul.f32 -1.442695, %v1001_v24  ;;  %v1763_v5 = vmul.f32 -1.442695, %v1002_v22 }
 0x2f8   :  { %1837 = vpow2.f32 %v1762_v21 }
 0x2f9   :  { %1839 = vpow2.f32 %v1763_v5 }
 0x2fa   :  { %v978_v19 = vpop.f32.mrf.mxu2  ;;  %v998_v20 = vpop.f32.mrf.mxu3 }
 0x2fb   :  { %v1003_v16 = vadd.f32 %v978_v19, %v3338_v7  ;;  %v1004_v11 = vadd.f32 %v998_v20, %v3339_v10 }
 0x2fd   :  { %v1764_v14 = vmul.f32 -1.442695, %v1003_v16 }
 0x2fe   :  { %v1838_v17 = vpop.eup %1837 }
 0x2ff   :  { %v1840_v3 = vpop.eup %1839  ;;  %v1014_v28 = vadd.f32 1.0, %v1838_v17  ;;  %1841 = vpow2.f32 %v1764_v14 }
 0x300   :  { %v1015_v8 = vadd.f32 1.0, %v1840_v3 }
 0x301   :  { %1843 = vrcp.f32 %v1014_v28  ;;  %v1028_v16 = vand.u32 2147483648, %v1014_v28  ;;  %v1026_v14 = vand.u32 2147483647, %v1014_v28  ;;  %vm1022_vm6 = vweird.f32 %v1014_v28 }
 0x302   :  { %1845 = vrcp.f32 %v1015_v8  ;;  %v1043_v7 = vand.u32 2147483648, %v1015_v8  ;;  %v1041_v15 = vand.u32 2147483647, %v1015_v8  ;;  %vm1037_vm7 = vweird.f32 %v1015_v8 }
 0x303   :  { %v1029_v10 = vor.u32 1.1754944e-38, %v1028_v16  ;;  %vm1027_vm10 = vcmp.eq.f32.partialorder %v1026_v14, 8.507059e+37 }
 0x304   :  { %vm1042_vm11 = vcmp.eq.f32.partialorder %v1041_v15, 8.507059e+37 }
 0x305   :  { %v1842_v25 = vpop.eup %1841 }
 0x306   :  { %v1016_v27 = vadd.f32 1.0, %v1842_v25 }
 0x307   :  { %v1844_v23 = vpop.eup %1843 }
 0x308   :  { %v1846_v22 = vpop.eup %1845  ;;  %v1018_v21 = vmul.f32 %v1844_v23, %v1014_v28  ;;  %1847 = vrcp.f32 %v1016_v27  ;;  %vm1023_vm4 = vweird.f32 %v1844_v23  ;;  %v1058_v16 = vand.u32 2147483648, %v1016_v27 }
 0x309   :  { %v1033_v24 = vmul.f32 %v1846_v22, %v1015_v8  ;;  %1849 = vtanh.f32 %v1004_v11  ;;  %vm1038_vm5 = vweird.f32 %v1846_v22  ;;  %vm1024_vm8 = vmor %vm1022_vm6, %vm1023_vm4  ;;  %vm1052_vm13 = vweird.f32 %v1016_v27 }
 0x30a   :  { %v1019_v5 = vsub.f32 1.0, %v1018_v21  ;;  %vm1039_vm9 = vmor %vm1037_vm7, %vm1038_vm5  ;;  %v1044_v21 = vor.u32 1.1754944e-38, %v1043_v7  ;;  %v1059_v14 = vor.u32 1.1754944e-38, %v1058_v16  ;;  %v3358_v16 = vld [vmem:[#allocation35_spill] sm:$0xff] }
 0x30b   :  { %v1034_v19 = vsub.f32 1.0, %v1033_v24 }
 0x30c   :  { %v1020_v17 = vmul.f32 %v1844_v23, %v1019_v5 }
 0x30d   :  { %v1035_v3 = vmul.f32 %v1846_v22, %v1034_v19 }
 0x30e   :  { %v1848_v18 = vpop.eup %1847  ;;  %v1021_v25 = vadd.f32 %v1844_v23, %v1020_v17 }
 0x30f   :  { %v1048_v20 = vmul.f32 %v1848_v18, %v1016_v27  ;;  %v1036_v6 = vadd.f32 %v1846_v22, %v1035_v3  ;;  %v1850_v11 = vpop.eup %1849  ;;  %vm1053_vm12 = vweird.f32 %v1848_v18  ;;  %v3347_v3 = vld [vmem:[#allocation24_spill] sm:$0xff] }
 0x310   :  { %v1025_v24 = vsel %vm1024_vm8, %v1844_v23, %v1021_v25  ;;  %v1056_v23 = vand.u32 2147483647, %v1016_v27  ;;  %vm1054_vm14 = vmor %vm1052_vm13, %vm1053_vm12  ;;  %v3345_v27 = vld [vmem:[#allocation22_spill] sm:$0xff]  ;;  %v3348_v25 = vld [vmem:[#allocation25_spill] sm:$0xff] }
 0x311   :  { %v1049_v4 = vsub.f32 1.0, %v1048_v20  ;;  %v1030_v5 = vsel %vm1027_vm10, %v1029_v10, %v1025_v24  ;;  %v1040_v2 = vsel %vm1039_vm9, %v1846_v22, %v1036_v6  ;;  %v3346_v22 = vld [vmem:[#allocation23_spill] sm:$0xff]  ;;  %v3349_v20 = vld [vmem:[#allocation26_spill] sm:$0xff]  ;;  %v3352_v24 = vld [vmem:[#allocation29_spill] sm:$0xff] }
 0x312   :  { %v1045_v19 = vsel %vm1042_vm11, %v1044_v21, %v1040_v2  ;;  %v1064_v1 = vmul.f32 %v1850_v11, %v1030_v5  ;;  %vm1057_vm15 = vcmp.eq.f32.partialorder %v1056_v23, 8.507059e+37  ;;  %v3350_v10 = vld [vmem:[#allocation27_spill] sm:$0xff]  ;;  %v3351_v21 = vld [vmem:[#allocation28_spill] sm:$0xff]  ;;  %v3353_v11 = vld [vmem:[#allocation30_spill] sm:$0xff] }
 0x313   :  { %v1063_v12 = vmul.f32 %v1045_v19, %v2856_v9  ;;  %v1050_v17 = vmul.f32 %v1848_v18, %v1049_v4  ;;  %v3340_v9 = vld [vmem:[#allocation17_spill] sm:$0xff]  ;;  %v3343_v4 = vld [vmem:[#allocation20_spill] sm:$0xff]  ;;  %v3354_v5 = vld [vmem:[#allocation31_spill] sm:$0xff] }
 0x314   :  { %v3355_v19 = vld [vmem:[#allocation32_spill] sm:$0xff] }
 0x315   :  { %v2940_v28 = vadd.f32 %v1064_v1, %v1063_v12  ;;  %v1051_v8 = vadd.f32 %v1848_v18, %v1050_v17  ;;  %v3341_v12 = vld [vmem:[#allocation18_spill] sm:$0xff]  ;;  %v3342_v1 = vld [vmem:[#allocation19_spill] sm:$0xff]  ;;  %v3356_v17 = vld [vmem:[#allocation33_spill] sm:$0xff] }
 0x316   :  { %v3359_v23 = vld [vmem:[#allocation36_spill] sm:$0xff] }
 0x317   :  { %1851 = vtanh.f32 %v2940_v28  ;;  %v1055_v7 = vsel %vm1054_vm14, %v1848_v18, %v1051_v8  ;;  %v3344_v18 = vld [vmem:[#allocation21_spill] sm:$0xff]  ;;  %v3357_v8 = vld [vmem:[#allocation34_spill] sm:$0xff] }
 0x318   :  { %v1060_v15 = vsel %vm1057_vm15, %v1059_v14, %v1055_v7  ;;  %v3360_v7 = vld [vmem:[#allocation37_spill] sm:$0xff]  ;;  %v3361_v14 = vld [vmem:[#allocation38_spill] sm:$0xff] }
 0x31d   :  { %v1852_v6 = vpop.eup %1851 }
 0x31e   :  { %v1067_v2 = vmul.f32 %v1852_v6, %v1060_v15  ;;  %v3362_v6 = vld [vmem:[#allocation39_spill] sm:$0xff]  ;;  %v3363_v15 = vld [vmem:[#allocation40_spill] sm:$0xff] }
 0x320   :  { %1091 = vmatmul.f32.vlgmr.msrb.gmra.mxu0 %v1067_v2  ;;  %1111 = vmatmul.f32.vlgmr.msrb.gmra.mxu1 %v1067_v2 }
 0x321   :  { %1131 = vmatmul.f32.vlgmr.msrb.gmra.mxu2 %v1067_v2  ;;  %1151 = vmatmul.f32.vlgmr.msrb.gmra.mxu3 %v1067_v2  ;;  %v3364_v2 = vld [vmem:[#allocation41_spill] sm:$0xff] }
 0x322   :  { %1383 = vmatpush.msrb.mxu0 %v2671_v59  ;;  %1403 = vmatpush.msrb.mxu1 %v2674_v29 }
 0x323   :  { %1423 = vmatpush.msrb.mxu2 %v2677_v30  ;;  %1443 = vmatpush.msrb.mxu3 %v2680_v31 }
 0x324   :  { %1384 = vmatpush.msrb.mxu0 %v2683_v32  ;;  %1404 = vmatpush.msrb.mxu1 %v2686_v33 }
 0x325   :  { %1424 = vmatpush.msrb.mxu2 %v2689_v34  ;;  %1444 = vmatpush.msrb.mxu3 %v2692_v35 }
 0x326   :  { %1385 = vmatpush.msrb.mxu0 %v2695_v36  ;;  %1405 = vmatpush.msrb.mxu1 %v2698_v37 }
 0x327   :  { %1425 = vmatpush.msrb.mxu2 %v2701_v38  ;;  %1445 = vmatpush.msrb.mxu3 %v2704_v40 }
 0x328   :  { %1386 = vmatpush.msrb.mxu0 %v2707_v41  ;;  %1406 = vmatpush.msrb.mxu1 %v2710_v42 }
 0x329   :  { %1426 = vmatpush.msrb.mxu2 %v2713_v43  ;;  %1446 = vmatpush.msrb.mxu3 %v2716_v63 }
 0x32a   :  { %1387 = vmatpush.msrb.mxu0 %v2719_v53  ;;  %1407 = vmatpush.msrb.mxu1 %v2722_v57 }
 0x32b   :  { %1427 = vmatpush.msrb.mxu2 %v2725_v45  ;;  %1447 = vmatpush.msrb.mxu3 %v2728_v49 }
 0x32c   :  { %1388 = vmatpush.msrb.mxu0 %v2731_v62  ;;  %1408 = vmatpush.msrb.mxu1 %v2734_v52 }
 0x32d   :  { %1428 = vmatpush.msrb.mxu2 %v2737_v48  ;;  %1448 = vmatpush.msrb.mxu3 %v2740_v55 }
 0x32e   :  { %1389 = vmatpush.msrb.mxu0 %v2743_v50  ;;  %1409 = vmatpush.msrb.mxu1 %v2746_v44 }
 0x32f   :  { %1429 = vmatpush.msrb.mxu2 %v2749_v51  ;;  %1449 = vmatpush.msrb.mxu3 %v2752_v39 }
 0x330   :  { %1390 = vmatpush.msrb.mxu0 %v2755_v58  ;;  %1410 = vmatpush.msrb.mxu1 %v2758_v0 }
 0x331   :  { %1430 = vmatpush.msrb.mxu2 %v2761_v26  ;;  %1450 = vmatpush.msrb.mxu3 %v2764_v47 }
 0x332   :  { %1391 = vmatpush.msrb.mxu0 %v2767_v54  ;;  %1411 = vmatpush.msrb.mxu1 %v2770_v46 }
 0x333   :  { %1431 = vmatpush.msrb.mxu2 %v2773_v56  ;;  %1451 = vmatpush.msrb.mxu3 %v2776_v60 }
 0x334   :  { %1392 = vmatpush.msrb.mxu0 %v2779_v61  ;;  %1412 = vmatpush.msrb.mxu1 %v2782_v13 }
 0x335   :  { %1432 = vmatpush.msrb.mxu2 %v3340_v9  ;;  %1452 = vmatpush.msrb.mxu3 %v3341_v12 }
 0x336   :  { %1393 = vmatpush.msrb.mxu0 %v3342_v1  ;;  %1413 = vmatpush.msrb.mxu1 %v3343_v4 }
 0x337   :  { %1433 = vmatpush.msrb.mxu2 %v3344_v18  ;;  %1453 = vmatpush.msrb.mxu3 %v3345_v27 }
 0x338   :  { %1394 = vmatpush.msrb.mxu0 %v3346_v22  ;;  %1414 = vmatpush.msrb.mxu1 %v3347_v3 }
 0x339   :  { %1434 = vmatpush.msrb.mxu2 %v3348_v25  ;;  %1454 = vmatpush.msrb.mxu3 %v3349_v20 }
 0x33a   :  { %1395 = vmatpush.msrb.mxu0 %v3350_v10  ;;  %1415 = vmatpush.msrb.mxu1 %v3351_v21 }
 0x33b   :  { %1435 = vmatpush.msrb.mxu2 %v3352_v24  ;;  %1455 = vmatpush.msrb.mxu3 %v3353_v11  ;;  %v3366_v11 = vld [vmem:[#allocation55_spill] sm:$0xff]  ;;  %v3367_v24 = vld [vmem:[#allocation56_spill] sm:$0xff] }
 0x33c   :  { %1396 = vmatpush.msrb.mxu0 %v3354_v5  ;;  %1416 = vmatpush.msrb.mxu1 %v3355_v19  ;;  %v3365_v5 = vld [vmem:[#allocation42_spill] sm:$0xff] }
 0x33d   :  { %1436 = vmatpush.msrb.mxu2 %v3356_v17  ;;  %1456 = vmatpush.msrb.mxu3 %v3357_v8 }
 0x33e   :  { %1397 = vmatpush.msrb.mxu0 %v3358_v16  ;;  %1417 = vmatpush.msrb.mxu1 %v3359_v23 }
 0x33f   :  { %1437 = vmatpush.msrb.mxu2 %v3360_v7  ;;  %1457 = vmatpush.msrb.mxu3 %v3361_v14  ;;  %v3368_v14 = vld [vmem:[#allocation57_spill] sm:$0xff] }
 0x340   :  { %1398 = vmatpush.msrb.mxu0 %v3362_v6  ;;  %1418 = vmatpush.msrb.mxu1 %v3363_v15 }
 0x341   :  { %1438 = vmatpush.msrb.mxu2 %v3364_v2  ;;  %1458 = vmatpush.msrb.mxu3 %v3365_v5 }
 0x39d   :  { %v1092_v19 = vpop.f32.mrf.mxu0  ;;  %v1112_v17 = vpop.f32.mrf.mxu1 }
 0x39e   :  { %v1155_v8 = vadd.f32 %v1092_v19, %v3366_v11  ;;  %v1156_v16 = vadd.f32 %v1112_v17, %v3367_v24  ;;  %v3369_v24 = vld [vmem:[#allocation58_spill] sm:$0xff] }
 0x3a0   :  { %v1765_v21 = vmul.f32 -1.442695, %v1155_v8  ;;  %v1766_v23 = vmul.f32 -1.442695, %v1156_v16 }
 0x3a2   :  { %1853 = vpow2.f32 %v1765_v21 }
 0x3a3   :  { %1855 = vpow2.f32 %v1766_v23 }
 0x3a4   :  { %v1132_v7 = vpop.f32.mrf.mxu2  ;;  %v1152_v5 = vpop.f32.mrf.mxu3 }
 0x3a5   :  { %v1157_v10 = vadd.f32 %v1132_v7, %v3368_v14  ;;  %v1158_v17 = vadd.f32 %v1152_v5, %v3369_v24 }
 0x3a7   :  { %v1767_v6 = vmul.f32 -1.442695, %v1157_v10 }
 0x3a8   :  { %v1854_v20 = vpop.eup %1853 }
 0x3a9   :  { %v1856_v15 = vpop.eup %1855  ;;  %v1168_v25 = vadd.f32 1.0, %v1854_v20  ;;  %1857 = vpow2.f32 %v1767_v6 }
 0x3aa   :  { %v1169_v2 = vadd.f32 1.0, %v1856_v15 }
 0x3ab   :  { %1859 = vrcp.f32 %v1168_v25  ;;  %v1182_v10 = vand.u32 2147483648, %v1168_v25  ;;  %v1180_v6 = vand.u32 2147483647, %v1168_v25  ;;  %vm1176_vm2 = vweird.f32 %v1168_v25 }
 0x3ac   :  { %1861 = vrcp.f32 %v1169_v2  ;;  %v1197_v14 = vand.u32 2147483648, %v1169_v2  ;;  %v1195_v22 = vand.u32 2147483647, %v1169_v2  ;;  %vm1191_vm3 = vweird.f32 %v1169_v2 }
 0x3ad   :  { %v1183_v24 = vor.u32 1.1754944e-38, %v1182_v10  ;;  %vm1181_vm6 = vcmp.eq.f32.partialorder %v1180_v6, 8.507059e+37 }
 0x3ae   :  { %vm1196_vm7 = vcmp.eq.f32.partialorder %v1195_v22, 8.507059e+37 }
 0x3af   :  { %v1858_v3 = vpop.eup %1857 }
 0x3b0   :  { %v1170_v11 = vadd.f32 1.0, %v1858_v3 }
 0x3b1   :  { %v1860_v19 = vpop.eup %1859 }
 0x3b2   :  { %v1862_v8 = vpop.eup %1861  ;;  %v1172_v21 = vmul.f32 %v1860_v19, %v1168_v25  ;;  %1863 = vrcp.f32 %v1170_v11  ;;  %vm1177_vm0 = vweird.f32 %v1860_v19  ;;  %v1212_v10 = vand.u32 2147483648, %v1170_v11 }
 0x3b3   :  { %v1187_v16 = vmul.f32 %v1862_v8, %v1169_v2  ;;  %1865 = vtanh.f32 %v1158_v17  ;;  %vm1192_vm1 = vweird.f32 %v1862_v8  ;;  %vm1178_vm4 = vmor %vm1176_vm2, %vm1177_vm0  ;;  %vm1206_vm9 = vweird.f32 %v1170_v11 }
 0x3b4   :  { %v1173_v23 = vsub.f32 1.0, %v1172_v21  ;;  %vm1193_vm5 = vmor %vm1191_vm3, %vm1192_vm1  ;;  %v1198_v21 = vor.u32 1.1754944e-38, %v1197_v14  ;;  %v1213_v6 = vor.u32 1.1754944e-38, %v1212_v10 }
 0x3b5   :  { %v1188_v7 = vsub.f32 1.0, %v1187_v16 }
 0x3b6   :  { %v1174_v20 = vmul.f32 %v1860_v19, %v1173_v23 }
 0x3b7   :  { %v1189_v15 = vmul.f32 %v1862_v8, %v1188_v7 }
 0x3b8   :  { %v1864_v27 = vpop.eup %1863  ;;  %v1175_v3 = vadd.f32 %v1860_v19, %v1174_v20 }
 0x3b9   :  { %v1202_v5 = vmul.f32 %v1864_v27, %v1170_v11  ;;  %v1190_v18 = vadd.f32 %v1862_v8, %v1189_v15  ;;  %v1866_v17 = vpop.eup %1865  ;;  %vm1207_vm8 = vweird.f32 %v1864_v27 }
 0x3ba   :  { %v1179_v16 = vsel %vm1178_vm4, %v1860_v19, %v1175_v3  ;;  %v1210_v19 = vand.u32 2147483647, %v1170_v11  ;;  %vm1208_vm10 = vmor %vm1206_vm9, %vm1207_vm8  ;;  %v3399_v3 = vld [vmem:[#allocation62_spill] sm:$0xff] }
 0x3bb   :  { %v1203_v4 = vsub.f32 1.0, %v1202_v5  ;;  %v1184_v23 = vsel %vm1181_vm6, %v1183_v24, %v1179_v16  ;;  %v1194_v1 = vsel %vm1193_vm5, %v1862_v8, %v1190_v18 }
 0x3bc   :  { %v1199_v7 = vsel %vm1196_vm7, %v1198_v21, %v1194_v1  ;;  %v1218_v12 = vmul.f32 %v1866_v17, %v1184_v23  ;;  %vm1211_vm11 = vcmp.eq.f32.partialorder %v1210_v19, 8.507059e+37 }
 0x3bd   :  { %v1217_v9 = vmul.f32 %v1199_v7, %v2940_v28  ;;  %v1204_v20 = vmul.f32 %v1864_v27, %v1203_v4 }
 0x3bf   :  { %v3012_v25 = vadd.f32 %v1218_v12, %v1217_v9  ;;  %v1205_v2 = vadd.f32 %v1864_v27, %v1204_v20 }
 0x3c1   :  { %1867 = vtanh.f32 %v3012_v25  ;;  %v1209_v14 = vsel %vm1208_vm10, %v1864_v27, %v1205_v2 }
 0x3c2   :  { %v1214_v22 = vsel %vm1211_vm11, %v1213_v6, %v1209_v14 }
 0x3c7   :  { %v1868_v18 = vpop.eup %1867 }
 0x3c8   :  { %v1221_v1 = vmul.f32 %v1868_v18, %v1214_v22 }
 0x3ca   :  { %1245 = vmatmul.f32.vlgmr.msra.gmra.mxu0 %v1221_v1  ;;  %1265 = vmatmul.f32.vlgmr.msra.gmra.mxu1 %v1221_v1 }
 0x3cb   :  { %1285 = vmatmul.f32.vlgmr.msra.gmra.mxu2 %v1221_v1  ;;  %1305 = vmatmul.f32.vlgmr.msra.gmra.mxu3 %v1221_v1 }
 0x3cc   :  { %1537 = vmatpush.msra.mxu0 %v2671_v59  ;;  %1557 = vmatpush.msra.mxu1 %v2674_v29  ;;  %v3370_v59 = vld [vmem:[#allocation17_spill] sm:$0xff]  ;;  %v3371_v29 = vld [vmem:[#allocation18_spill] sm:$0xff] }
 0x3cd   :  { %1577 = vmatpush.msra.mxu2 %v2677_v30  ;;  %1597 = vmatpush.msra.mxu3 %v2680_v31  ;;  %v3372_v30 = vld [vmem:[#allocation19_spill] sm:$0xff]  ;;  %v3373_v31 = vld [vmem:[#allocation20_spill] sm:$0xff] }
 0x3ce   :  { %1538 = vmatpush.msra.mxu0 %v2683_v32  ;;  %1558 = vmatpush.msra.mxu1 %v2686_v33  ;;  %v3374_v32 = vld [vmem:[#allocation21_spill] sm:$0xff]  ;;  %v3375_v33 = vld [vmem:[#allocation22_spill] sm:$0xff] }
 0x3cf   :  { %1578 = vmatpush.msra.mxu2 %v2689_v34  ;;  %1598 = vmatpush.msra.mxu3 %v2692_v35  ;;  %v3376_v34 = vld [vmem:[#allocation23_spill] sm:$0xff]  ;;  %v3377_v35 = vld [vmem:[#allocation24_spill] sm:$0xff] }
 0x3d0   :  { %1539 = vmatpush.msra.mxu0 %v2695_v36  ;;  %1559 = vmatpush.msra.mxu1 %v2698_v37  ;;  %v3378_v36 = vld [vmem:[#allocation25_spill] sm:$0xff]  ;;  %v3379_v37 = vld [vmem:[#allocation26_spill] sm:$0xff] }
 0x3d1   :  { %1579 = vmatpush.msra.mxu2 %v2701_v38  ;;  %1599 = vmatpush.msra.mxu3 %v2704_v40  ;;  %v3380_v38 = vld [vmem:[#allocation27_spill] sm:$0xff]  ;;  %v3381_v40 = vld [vmem:[#allocation28_spill] sm:$0xff] }
 0x3d2   :  { %1540 = vmatpush.msra.mxu0 %v2707_v41  ;;  %1560 = vmatpush.msra.mxu1 %v2710_v42  ;;  %v3382_v41 = vld [vmem:[#allocation29_spill] sm:$0xff]  ;;  %v3383_v42 = vld [vmem:[#allocation30_spill] sm:$0xff] }
 0x3d3   :  { %1580 = vmatpush.msra.mxu2 %v2713_v43  ;;  %1600 = vmatpush.msra.mxu3 %v2716_v63  ;;  %v3384_v43 = vld [vmem:[#allocation31_spill] sm:$0xff]  ;;  %v3385_v63 = vld [vmem:[#allocation32_spill] sm:$0xff] }
 0x3d4   :  { %1541 = vmatpush.msra.mxu0 %v2719_v53  ;;  %1561 = vmatpush.msra.mxu1 %v2722_v57  ;;  %v3386_v53 = vld [vmem:[#allocation33_spill] sm:$0xff]  ;;  %v3387_v57 = vld [vmem:[#allocation34_spill] sm:$0xff] }
 0x3d5   :  { %1581 = vmatpush.msra.mxu2 %v2725_v45  ;;  %1601 = vmatpush.msra.mxu3 %v2728_v49  ;;  %v3388_v45 = vld [vmem:[#allocation35_spill] sm:$0xff]  ;;  %v3389_v49 = vld [vmem:[#allocation36_spill] sm:$0xff] }
 0x3d6   :  { %1542 = vmatpush.msra.mxu0 %v2731_v62  ;;  %1562 = vmatpush.msra.mxu1 %v2734_v52  ;;  %v3390_v62 = vld [vmem:[#allocation37_spill] sm:$0xff]  ;;  %v3391_v52 = vld [vmem:[#allocation38_spill] sm:$0xff] }
 0x3d7   :  { %1582 = vmatpush.msra.mxu2 %v2737_v48  ;;  %1602 = vmatpush.msra.mxu3 %v2740_v55  ;;  %v3392_v48 = vld [vmem:[#allocation39_spill] sm:$0xff]  ;;  %v3393_v55 = vld [vmem:[#allocation40_spill] sm:$0xff] }
 0x3d8   :  { %1543 = vmatpush.msra.mxu0 %v2743_v50  ;;  %1563 = vmatpush.msra.mxu1 %v2746_v44  ;;  %v3394_v50 = vld [vmem:[#allocation41_spill] sm:$0xff]  ;;  %v3395_v44 = vld [vmem:[#allocation42_spill] sm:$0xff] }
 0x3d9   :  { %1583 = vmatpush.msra.mxu2 %v2749_v51  ;;  %1603 = vmatpush.msra.mxu3 %v2752_v39 }
 0x3da   :  { %1544 = vmatpush.msra.mxu0 %v2755_v58  ;;  %1564 = vmatpush.msra.mxu1 %v2758_v0  ;;  %v3396_v58 = vld [vmem:[#allocation59_spill] sm:$0xff] }
 0x3db   :  { %1584 = vmatpush.msra.mxu2 %v2761_v26  ;;  %1604 = vmatpush.msra.mxu3 %v2764_v47  ;;  %v3397_v26 = vld [vmem:[#allocation60_spill] sm:$0xff] }
 0x3dc   :  { %1545 = vmatpush.msra.mxu0 %v2767_v54  ;;  %1565 = vmatpush.msra.mxu1 %v2770_v46 }
 0x3dd   :  { %1585 = vmatpush.msra.mxu2 %v2773_v56  ;;  %1605 = vmatpush.msra.mxu3 %v2776_v60  ;;  %v3398_v60 = vld [vmem:[#allocation61_spill] sm:$0xff] }
 0x3de   :  { %1546 = vmatpush.msra.mxu0 %v2779_v61  ;;  %1566 = vmatpush.msra.mxu1 %v2782_v13 }
 0x3df   :  { %1586 = vmatpush.msra.mxu2 %v3370_v59  ;;  %1606 = vmatpush.msra.mxu3 %v3371_v29 }
 0x3e0   :  { %1547 = vmatpush.msra.mxu0 %v3372_v30  ;;  %1567 = vmatpush.msra.mxu1 %v3373_v31 }
 0x3e1   :  { %1587 = vmatpush.msra.mxu2 %v3374_v32  ;;  %1607 = vmatpush.msra.mxu3 %v3375_v33 }
 0x3e2   :  { %1548 = vmatpush.msra.mxu0 %v3376_v34  ;;  %1568 = vmatpush.msra.mxu1 %v3377_v35 }
 0x3e3   :  { %1588 = vmatpush.msra.mxu2 %v3378_v36  ;;  %1608 = vmatpush.msra.mxu3 %v3379_v37 }
 0x3e4   :  { %1549 = vmatpush.msra.mxu0 %v3380_v38  ;;  %1569 = vmatpush.msra.mxu1 %v3381_v40 }
 0x3e5   :  { %1589 = vmatpush.msra.mxu2 %v3382_v41  ;;  %1609 = vmatpush.msra.mxu3 %v3383_v42 }
 0x3e6   :  { %1550 = vmatpush.msra.mxu0 %v3384_v43  ;;  %1570 = vmatpush.msra.mxu1 %v3385_v63 }
 0x3e7   :  { %1590 = vmatpush.msra.mxu2 %v3386_v53  ;;  %1610 = vmatpush.msra.mxu3 %v3387_v57 }
 0x3e8   :  { %1551 = vmatpush.msra.mxu0 %v3388_v45  ;;  %1571 = vmatpush.msra.mxu1 %v3389_v49 }
 0x3e9   :  { %1591 = vmatpush.msra.mxu2 %v3390_v62  ;;  %1611 = vmatpush.msra.mxu3 %v3391_v52  ;;  %v3400_v52 = vld [vmem:[#allocation63_spill] sm:$0xff] }
 0x3ea   :  { %1552 = vmatpush.msra.mxu0 %v3392_v48  ;;  %1572 = vmatpush.msra.mxu1 %v3393_v55  ;;  %v3401_v55 = vld [vmem:[#allocation64_spill] sm:$0xff] }
 0x3eb   :  { %1592 = vmatpush.msra.mxu2 %v3394_v50  ;;  %1612 = vmatpush.msra.mxu3 %v3395_v44 }
 0x447   :  { %v1246_v51 = vpop.f32.mrf.mxu0  ;;  %v1266_v39 = vpop.f32.mrf.mxu1 }
 0x448   :  { %v1309_v0 = vadd.f32 %v1246_v51, %v3396_v58  ;;  %v1310_v47 = vadd.f32 %v1266_v39, %v3397_v26  ;;  %v3402_v58 = vld [vmem:[#allocation65_spill] sm:$0xff] }
 0x44a   :  { %v1768_v54 = vmul.f32 -1.442695, %v1309_v0  ;;  %v1769_v46 = vmul.f32 -1.442695, %v1310_v47 }
 0x44c   :  { %1869 = vpow2.f32 %v1768_v54 }
 0x44d   :  { %1871 = vpow2.f32 %v1769_v46 }
 0x44e   :  { %v1286_v56 = vpop.f32.mrf.mxu2  ;;  %v1306_v27 = vpop.f32.mrf.mxu3 }
 0x44f   :  { %v1311_v61 = vadd.f32 %v1286_v56, %v3398_v60  ;;  %v1312_v5 = vadd.f32 %v1306_v27, %v3399_v3 }
 0x451   :  { %v1770_v13 = vmul.f32 -1.442695, %v1311_v61 }
 0x452   :  { %v1870_v28 = vpop.eup %1869 }
 0x453   :  { %v1872_v9 = vpop.eup %1871  ;;  %v1322_v12 = vadd.f32 1.0, %v1870_v28  ;;  %1873 = vpow2.f32 %v1770_v13 }
 0x454   :  { %v1323_v4 = vadd.f32 1.0, %v1872_v9  ;;  %v3403_v9 = vld [vmem:[#allocation66_spill] sm:$0xff] }
 0x455   :  { %1875 = vrcp.f32 %v1322_v12  ;;  %v1336_v7 = vand.u32 2147483648, %v1322_v12  ;;  %v1334_v10 = vand.u32 2147483647, %v1322_v12  ;;  %vm1330_vm14 = vweird.f32 %v1322_v12 }
 0x456   :  { %1877 = vrcp.f32 %v1323_v4  ;;  %v1351_v20 = vand.u32 2147483648, %v1323_v4  ;;  %v1349_v14 = vand.u32 2147483647, %v1323_v4  ;;  %vm1345_vm15 = vweird.f32 %v1323_v4 }
 0x457   :  { %v1337_v1 = vor.u32 1.1754944e-38, %v1336_v7  ;;  %vm1335_vm2 = vcmp.eq.f32.partialorder %v1334_v10, 8.507059e+37 }
 0x458   :  { %v1352_v29 = vor.u32 1.1754944e-38, %v1351_v20  ;;  %vm1350_vm3 = vcmp.eq.f32.partialorder %v1349_v14, 8.507059e+37 }
 0x459   :  { %v1874_v11 = vpop.eup %1873 }
 0x45a   :  { %v1324_v8 = vadd.f32 1.0, %v1874_v11 }
 0x45b   :  { %v1876_v15 = vpop.eup %1875 }
 0x45c   :  { %v1878_v24 = vpop.eup %1877  ;;  %v1326_v21 = vmul.f32 %v1876_v15, %v1322_v12  ;;  %1879 = vrcp.f32 %v1324_v8  ;;  %vm1331_vm12 = vweird.f32 %v1876_v15  ;;  %v1366_v42 = vand.u32 2147483648, %v1324_v8 }
 0x45d   :  { %v1341_v16 = vmul.f32 %v1878_v24, %v1323_v4  ;;  %1881 = vtanh.f32 %v1312_v5  ;;  %vm1346_vm13 = vweird.f32 %v1878_v24  ;;  %vm1332_vm0 = vmor %vm1330_vm14, %vm1331_vm12  ;;  %vm1360_vm5 = vweird.f32 %v1324_v8 }
 0x45e   :  { %v1327_v17 = vsub.f32 1.0, %v1326_v21  ;;  %vm1347_vm1 = vmor %vm1345_vm15, %vm1346_vm13  ;;  %v1364_v43 = vand.u32 2147483647, %v1324_v8  ;;  %v1367_v53 = vor.u32 1.1754944e-38, %v1366_v42 }
 0x45f   :  { %v1342_v23 = vsub.f32 1.0, %v1341_v16 }
 0x460   :  { %v1328_v2 = vmul.f32 %v1876_v15, %v1327_v17  ;;  %vm1365_vm7 = vcmp.eq.f32.partialorder %v1364_v43, 8.507059e+37  ;;  %v1698_v43 = vld [vmem:[#allocation11 + $0x70] sm:$0xff] }
 0x461   :  { %v1343_v19 = vmul.f32 %v1878_v24, %v1342_v23 }
 0x462   :  { %v1880_v6 = vpop.eup %1879  ;;  %v1329_v18 = vadd.f32 %v1876_v15, %v1328_v2 }
 0x463   :  { %v1356_v22 = vmul.f32 %v1880_v6, %v1324_v8  ;;  %v1344_v59 = vadd.f32 %v1878_v24, %v1343_v19  ;;  %v1882_v31 = vpop.eup %1881  ;;  %vm1361_vm4 = vweird.f32 %v1880_v6 }
 0x464   :  { %v1333_v30 = vsel %vm1332_vm0, %v1876_v15, %v1329_v18  ;;  %vm1362_vm6 = vmor %vm1360_vm5, %vm1361_vm4 }
 0x465   :  { %v1357_v32 = vsub.f32 1.0, %v1356_v22  ;;  %v1338_v33 = vsel %vm1335_vm2, %v1337_v1, %v1333_v30  ;;  %v1348_v34 = vsel %vm1347_vm1, %v1878_v24, %v1344_v59 }
 0x466   :  { %v1353_v35 = vsel %vm1350_vm3, %v1352_v29, %v1348_v34  ;;  %v1372_v36 = vmul.f32 %v1882_v31, %v1338_v33 }
 0x467   :  { %v1371_v37 = vmul.f32 %v1353_v35, %v3012_v25  ;;  %v1358_v38 = vmul.f32 %v1880_v6, %v1357_v32 }
 0x469   :  { %v3084_v40 = vadd.f32 %v1372_v36, %v1371_v37  ;;  %v1359_v41 = vadd.f32 %v1880_v6, %v1358_v38 }
 0x46b   :  { %1883 = vtanh.f32 %v3084_v40  ;;  %v1363_v63 = vsel %vm1362_vm6, %v1880_v6, %v1359_v41 }
 0x46c   :  { %v1368_v45 = vsel %vm1365_vm7, %v1367_v53, %v1363_v63  ;;  %v1697_v63 = vld [vmem:[#allocation11 + $0x68] sm:$0xff]  ;;  %v1696_v53 = vld [vmem:[#allocation11 + $0x60] sm:$0xff] }
 0x471   :  { %v1884_v57 = vpop.eup %1883 }
 0x472   :  { %v1375_v49 = vmul.f32 %v1884_v57, %v1368_v45  ;;  %v1695_v57 = vld [vmem:[#allocation11 + $0x58] sm:$0xff]  ;;  %v1694_v45 = vld [vmem:[#allocation11 + $0x50] sm:$0xff] }
 0x474   :  { %1399 = vmatmul.f32.vlgmr.msrb.gmra.mxu0 %v1375_v49  ;;  %1419 = vmatmul.f32.vlgmr.msrb.gmra.mxu1 %v1375_v49 }
 0x475   :  { %1439 = vmatmul.f32.vlgmr.msrb.gmra.mxu2 %v1375_v49  ;;  %1459 = vmatmul.f32.vlgmr.msrb.gmra.mxu3 %v1375_v49  ;;  %v1693_v49 = vld [vmem:[#allocation11 + $0x48] sm:$0xff] }
 0x4f1   :  { %v1400_v25 = vpop.f32.mrf.mxu0  ;;  %v1420_v62 = vpop.f32.mrf.mxu1 }
 0x4f2   :  { %v1463_v48 = vadd.f32 %v1400_v25, %v3400_v52  ;;  %v1464_v50 = vadd.f32 %v1420_v62, %v3401_v55  ;;  %v1692_v25 = vld [vmem:[#allocation11 + $0x40] sm:$0xff]  ;;  %v1691_v62 = vld [vmem:[#allocation11 + $0x38] sm:$0xff]  ;;  %v1690_v52 = vld [vmem:[#allocation11 + $0x30] sm:$0xff] }
 0x4f4   :  { %v1771_v44 = vmul.f32 -1.442695, %v1463_v48  ;;  %v1772_v51 = vmul.f32 -1.442695, %v1464_v50  ;;  %v3404_v50 = vld [vmem:[#allocation67_spill] sm:$0xff] }
 0x4f6   :  { %1885 = vpow2.f32 %v1771_v44 }
 0x4f7   :  { %1887 = vpow2.f32 %v1772_v51  ;;  %v3405_v51 = vld [vmem:[#allocation68_spill] sm:$0xff] }
 0x4f8   :  { %v1440_v39 = vpop.f32.mrf.mxu2  ;;  %v1460_v60 = vpop.f32.mrf.mxu3 }
 0x4f9   :  { %v1465_v0 = vadd.f32 %v1440_v39, %v3402_v58  ;;  %v1466_v12 = vadd.f32 %v1460_v60, %v3403_v9  ;;  %v1689_v58 = vld [vmem:[#allocation11 + $0x28] sm:$0xff] }
 0x4fa   :  { %v1685_v60 = vld [vmem:[#allocation11 + $0x8] sm:$0xff] }
 0x4fb   :  { %v1773_v26 = vmul.f32 -1.442695, %v1465_v0 }
 0x4fc   :  { %v1886_v47 = vpop.eup %1885 }
 0x4fd   :  { %v1888_v54 = vpop.eup %1887  ;;  %v1476_v46 = vadd.f32 1.0, %v1886_v47  ;;  %1889 = vpow2.f32 %v1773_v26  ;;  %v1688_v47 = vld [vmem:[#allocation11 + $0x20] sm:$0xff] }
 0x4fe   :  { %v1477_v56 = vadd.f32 1.0, %v1888_v54  ;;  %v1687_v54 = vld [vmem:[#allocation11 + $0x18] sm:$0xff] }
 0x4ff   :  { %1891 = vrcp.f32 %v1476_v46  ;;  %v1490_v3 = vand.u32 2147483648, %v1476_v46  ;;  %v1488_v21 = vand.u32 2147483647, %v1476_v46  ;;  %vm1484_vm10 = vweird.f32 %v1476_v46 }
 0x500   :  { %1893 = vrcp.f32 %v1477_v56  ;;  %v1505_v5 = vand.u32 2147483648, %v1477_v56  ;;  %v1503_v17 = vand.u32 2147483647, %v1477_v56  ;;  %vm1499_vm11 = vweird.f32 %v1477_v56 }
 0x501   :  { %v1491_v2 = vor.u32 1.1754944e-38, %v1490_v3  ;;  %vm1489_vm14 = vcmp.eq.f32.partialorder %v1488_v21, 8.507059e+37 }
 0x502   :  { %v1506_v19 = vor.u32 1.1754944e-38, %v1505_v5  ;;  %vm1504_vm15 = vcmp.eq.f32.partialorder %v1503_v17, 8.507059e+37 }
 0x503   :  { %v1890_v61 = vpop.eup %1889 }
 0x504   :  { %v1478_v13 = vadd.f32 1.0, %v1890_v61  ;;  %v3406_v61 = vld [vmem:[#allocation69_spill] sm:$0xff] }
 0x505   :  { %v1892_v28 = vpop.eup %1891 }
 0x506   :  { %v1894_v4 = vpop.eup %1893  ;;  %v1480_v27 = vmul.f32 %v1892_v28, %v1476_v46  ;;  %1895 = vrcp.f32 %v1478_v13  ;;  %vm1485_vm8 = vweird.f32 %v1892_v28  ;;  %v1520_v34 = vand.u32 2147483648, %v1478_v13  ;;  %v1686_v46 = vld [vmem:[#allocation11 + $0x10] sm:$0xff] }
 0x507   :  { %v1495_v11 = vmul.f32 %v1894_v4, %v1477_v56  ;;  %1897 = vtanh.f32 %v1466_v12  ;;  %vm1500_vm9 = vweird.f32 %v1894_v4  ;;  %vm1486_vm12 = vmor %vm1484_vm10, %vm1485_vm8  ;;  %vm1514_vm1 = vweird.f32 %v1478_v13 }
 0x508   :  { %v1481_v8 = vsub.f32 1.0, %v1480_v27  ;;  %vm1501_vm13 = vmor %vm1499_vm11, %vm1500_vm9  ;;  %v1518_v35 = vand.u32 2147483647, %v1478_v13  ;;  %v1521_v37 = vor.u32 1.1754944e-38, %v1520_v34 }
 0x509   :  { %v1496_v15 = vsub.f32 1.0, %v1495_v11 }
 0x50a   :  { %v1482_v24 = vmul.f32 %v1892_v28, %v1481_v8  ;;  %vm1519_vm3 = vcmp.eq.f32.partialorder %v1518_v35, 8.507059e+37 }
 0x50b   :  { %v1497_v16 = vmul.f32 %v1894_v4, %v1496_v15 }
 0x50c   :  { %v1896_v23 = vpop.eup %1895  ;;  %v1483_v7 = vadd.f32 %v1892_v28, %v1482_v24  ;;  %v3407_v24 = vld [vmem:[#allocation70_spill] sm:$0xff] }
 0x50d   :  { %v1510_v20 = vmul.f32 %v1896_v23, %v1478_v13  ;;  %v1498_v10 = vadd.f32 %v1894_v4, %v1497_v16  ;;  %v1898_v6 = vpop.eup %1897  ;;  %vm1515_vm0 = vweird.f32 %v1896_v23 }
 0x50e   :  { %v1487_v14 = vsel %vm1486_vm12, %v1892_v28, %v1483_v7  ;;  %vm1516_vm2 = vmor %vm1514_vm1, %vm1515_vm0  ;;  %v1684_v28 = vld [vmem:[#allocation11] sm:$0xff] }
 0x50f   :  { %v1511_v18 = vsub.f32 1.0, %v1510_v20  ;;  %v1492_v22 = vsel %vm1489_vm14, %v1491_v2, %v1487_v14  ;;  %v1502_v1 = vsel %vm1501_vm13, %v1894_v4, %v1498_v10 }
 0x510   :  { %v1507_v59 = vsel %vm1504_vm15, %v1506_v19, %v1502_v1  ;;  %v1526_v29 = vmul.f32 %v1898_v6, %v1492_v22 }
 0x511   :  { %v1525_v30 = vmul.f32 %v1507_v59, %v3084_v40  ;;  %v1512_v31 = vmul.f32 %v1896_v23, %v1511_v18  ;;  %v1699_v40 = vld [vmem:[#allocation11 + $0x78] sm:$0xff] }
 0x512   :  { %1704 = vmatpush.msrb.mxu0 %v1699_v40 }
 0x513   :  { %v3092_v32 = vadd.f32 %v1526_v29, %v1525_v30  ;;  %v1513_v33 = vadd.f32 %v1896_v23, %v1512_v31 }
 0x514   :  { %1705 = vmatpush.msrb.mxu0 %v1698_v43 }
 0x515   :  { %1899 = vtanh.f32 %v3092_v32  ;;  %v1517_v36 = vsel %vm1516_vm2, %v1896_v23, %v1513_v33 }
 0x516   :  { %v1522_v41 = vsel %vm1519_vm3, %v1521_v37, %v1517_v36  ;;  %1706 = vmatpush.msrb.mxu0 %v1697_v63 }
 0x518   :  { %1707 = vmatpush.msrb.mxu0 %v1696_v53 }
 0x51a   :  { %1708 = vmatpush.msrb.mxu0 %v1695_v57 }
 0x51b   :  { %v1900_v38 = vpop.eup %1899 }
 0x51c   :  { %v1529_v42 = vmul.f32 %v1900_v38, %v1522_v41  ;;  %1709 = vmatpush.msrb.mxu0 %v1694_v45 }
 0x51e   :  { %1553 = vmatmul.f32.vlgmr.msra.gmra.mxu0 %v1529_v42  ;;  %1573 = vmatmul.f32.vlgmr.msra.gmra.mxu1 %v1529_v42 }
 0x51f   :  { %1593 = vmatmul.f32.vlgmr.msra.gmra.mxu2 %v1529_v42  ;;  %1613 = vmatmul.f32.vlgmr.msra.gmra.mxu3 %v1529_v42 }
 0x520   :  { %1710 = vmatpush.msrb.mxu0 %v1693_v49 }
 0x522   :  { %1711 = vmatpush.msrb.mxu0 %v1692_v25 }
 0x524   :  { %1712 = vmatpush.msrb.mxu0 %v1691_v62 }
 0x526   :  { %1713 = vmatpush.msrb.mxu0 %v1690_v52 }
 0x528   :  { %1714 = vmatpush.msrb.mxu0 %v1689_v58 }
 0x52a   :  { %1715 = vmatpush.msrb.mxu0 %v1688_v47 }
 0x52c   :  { %1716 = vmatpush.msrb.mxu0 %v1687_v54 }
 0x52e   :  { %1717 = vmatpush.msrb.mxu0 %v1686_v46 }
 0x530   :  { %1718 = vmatpush.msrb.mxu0 %v1685_v60 }
 0x532   :  { %1719 = vmatpush.msrb.mxu0 %v1684_v28 }
 0x59b   :  { %v1554_v48 = vpop.f32.mrf.mxu0  ;;  %v1574_v55 = vpop.f32.mrf.mxu1 }
 0x59c   :  { %v1617_v44 = vadd.f32 %v1554_v48, %v3404_v50  ;;  %v1618_v39 = vadd.f32 %v1574_v55, %v3405_v51 }
 0x59e   :  { %v1774_v0 = vmul.f32 -1.442695, %v1617_v44  ;;  %v1775_v26 = vmul.f32 -1.442695, %v1618_v39 }
 0x5a0   :  { %1901 = vpow2.f32 %v1774_v0 }
 0x5a1   :  { %1903 = vpow2.f32 %v1775_v26 }
 0x5a2   :  { %v1594_v56 = vpop.f32.mrf.mxu2  ;;  %v1614_v8 = vpop.f32.mrf.mxu3 }
 0x5a3   :  { %v1619_v13 = vadd.f32 %v1594_v56, %v3406_v61  ;;  %v1620_v21 = vadd.f32 %v1614_v8, %v3407_v24 }
 0x5a5   :  { %v1776_v9 = vmul.f32 -1.442695, %v1619_v13 }
 0x5a6   :  { %v1902_v12 = vpop.eup %1901 }
 0x5a7   :  { %v1904_v4 = vpop.eup %1903  ;;  %v1630_v27 = vadd.f32 1.0, %v1902_v12  ;;  %1905 = vpow2.f32 %v1776_v9 }
 0x5a8   :  { %v1631_v11 = vadd.f32 1.0, %v1904_v4 }
 0x5a9   :  { %1907 = vrcp.f32 %v1630_v27  ;;  %v1644_v2 = vand.u32 2147483648, %v1630_v27  ;;  %v1642_v14 = vand.u32 2147483647, %v1630_v27  ;;  %vm1638_vm6 = vweird.f32 %v1630_v27 }
 0x5aa   :  { %1909 = vrcp.f32 %v1631_v11  ;;  %v1659_v10 = vand.u32 2147483648, %v1631_v11  ;;  %v1657_v18 = vand.u32 2147483647, %v1631_v11  ;;  %vm1653_vm7 = vweird.f32 %v1631_v11 }
 0x5ab   :  { %v1645_v29 = vor.u32 1.1754944e-38, %v1644_v2  ;;  %vm1643_vm10 = vcmp.eq.f32.partialorder %v1642_v14, 8.507059e+37 }
 0x5ac   :  { %v1660_v31 = vor.u32 1.1754944e-38, %v1659_v10  ;;  %vm1658_vm11 = vcmp.eq.f32.partialorder %v1657_v18, 8.507059e+37 }
 0x5ad   :  { %v1906_v15 = vpop.eup %1905 }
 0x5ae   :  { %v1632_v3 = vadd.f32 1.0, %v1906_v15 }
 0x5af   :  { %v1908_v5 = vpop.eup %1907 }
 0x5b0   :  { %v1910_v16 = vpop.eup %1909  ;;  %v1634_v17 = vmul.f32 %v1908_v5, %v1630_v27  ;;  %1911 = vrcp.f32 %v1632_v3  ;;  %vm1639_vm4 = vweird.f32 %v1908_v5  ;;  %v1674_v53 = vand.u32 2147483648, %v1632_v3 }
 0x5b1   :  { %v1649_v23 = vmul.f32 %v1910_v16, %v1631_v11  ;;  %1913 = vtanh.f32 %v1620_v21  ;;  %vm1654_vm5 = vweird.f32 %v1910_v16  ;;  %vm1640_vm8 = vmor %vm1638_vm6, %vm1639_vm4  ;;  %vm1668_vm13 = vweird.f32 %v1632_v3 }
 0x5b2   :  { %v1635_v7 = vsub.f32 1.0, %v1634_v17  ;;  %vm1655_vm9 = vmor %vm1653_vm7, %vm1654_vm5  ;;  %v1672_v57 = vand.u32 2147483647, %v1632_v3  ;;  %v1675_v49 = vor.u32 1.1754944e-38, %v1674_v53 }
 0x5b3   :  { %v1650_v20 = vsub.f32 1.0, %v1649_v23 }
 0x5b4   :  { %v1636_v19 = vmul.f32 %v1908_v5, %v1635_v7  ;;  %vm1673_vm15 = vcmp.eq.f32.partialorder %v1672_v57, 8.507059e+37 }
 0x5b5   :  { %v1651_v6 = vmul.f32 %v1910_v16, %v1650_v20 }
 0x5b6   :  { %v1912_v22 = vpop.eup %1911  ;;  %v1637_v1 = vadd.f32 %v1908_v5, %v1636_v19 }
 0x5b7   :  { %v1664_v59 = vmul.f32 %v1912_v22, %v1632_v3  ;;  %v1652_v30 = vadd.f32 %v1910_v16, %v1651_v6  ;;  %v1914_v34 = vpop.eup %1913  ;;  %vm1669_vm12 = vweird.f32 %v1912_v22 }
 0x5b8   :  { %v1641_v33 = vsel %vm1640_vm8, %v1908_v5, %v1637_v1  ;;  %vm1670_vm14 = vmor %vm1668_vm13, %vm1669_vm12 }
 0x5b9   :  { %v1665_v35 = vsub.f32 1.0, %v1664_v59  ;;  %v1646_v36 = vsel %vm1643_vm10, %v1645_v29, %v1641_v33  ;;  %v1656_v37 = vsel %vm1655_vm9, %v1910_v16, %v1652_v30 }
 0x5ba   :  { %v1661_v38 = vsel %vm1658_vm11, %v1660_v31, %v1656_v37  ;;  %v1680_v41 = vmul.f32 %v1914_v34, %v1646_v36 }
 0x5bb   :  { %v1679_v42 = vmul.f32 %v1661_v38, %v3092_v32  ;;  %v1666_v40 = vmul.f32 %v1912_v22, %v1665_v35  ;;  %v1788_v32 = vld [vmem:[%s3111_s5] ss:$0 sm:$0xff] }
 0x5bd   :  { %v1681_v43 = vadd.f32 %v1680_v41, %v1679_v42  ;;  %v1667_v63 = vadd.f32 %v1912_v22, %v1666_v40 }
 0x5bf   :  { %1915 = vtanh.f32 %v1681_v43  ;;  %v1671_v45 = vsel %vm1670_vm14, %v1912_v22, %v1667_v63 }
 0x5c0   :  { %v1676_v62 = vsel %vm1673_vm15, %v1675_v49, %v1671_v45 }
 0x5c5   :  { %v1916_v25 = vpop.eup %1915 }
 0x5c6   :  { %v1683_v52 = vmul.f32 %v1916_v25, %v1676_v62 }
 0x5c8   :  { %1720 = vmatmul.f32.vlgmr.msrb.gmra.mxu0 %v1683_v52 }
 0x645   :  { %v1721_v48 = vpop.f32.mrf.mxu0 }
 0x646   :  { %v1722_v55 = vadd.f32 %v1788_v32, %v1721_v48 }
 0x648   :  { %1724 = vst [vmem:[#allocation12] sm:$0xff] %v1722_v55 }
 0x649   :  { %1735 = dma.vmem_to_hbm [thread:$0]  %s1731_s24, 128, %s1733_s27, [#allocation5]  }
 0x64a   :  { %2131 = dma.done.wait [#allocation5], 128  }
 0x64b   :  { %2132 = vsyncadd [#allocation5], 4294967168 }
 0x64c   :  { %1740 = vsyncpa [#allocation4], 1 }
 0x64d   :  { %1741 = vsyncpa [#allocation7], 1 }
 0x64e   :  { %1742 = vsyncpa [#allocation10], 1 }
 0x64f   :  { %1743 = vsyncpa [#allocation5], 1 }

</bundles_post_ra>
